<compile_context>
chip_gen: v6e
topology: v6e:2x2x1
jax: 0.10.0
libtpu: 0.0.40
codegen_flags: <defaults>
</compile_context>

<pallas_src>
import functools

import jax
import jax.numpy as jnp
from jax.experimental import pallas as pl
from jax.experimental.pallas import tpu as pltpu


def _round_up(n, m):
    return ((n + m - 1) // m) * m


def _pad2(a, rows, cols):
    return jnp.pad(a, ((0, rows - a.shape[0]), (0, cols - a.shape[1])))


def _dual_attention_ae_kernel(
    x_ref, wfused_ref, b1_ref, w2_ref, b2_ref, w3_ref, b3_ref, w4_ref, b4_ref,
    rec_ref, pam_ref,
    *, valid_d, valid_b, padded_b, batch_tile, steps_per_core,
):
    c = pl.program_id(0)            # parallel (per-core) axis
    i = pl.program_id(1)            # arbitrary (batch-tile / reduction) axis
    dp = pam_ref.shape[-1]

    x = x_ref[...]                                              # (TB, Dp) bf16

    # Fused MXU push: [pairwise scores | encoder-1 pre-activation], shared LHS.
    fused = jnp.dot(x, wfused_ref[...],
                    preferred_element_type=jnp.float32)         # (TB, Dp+Hp)
    scores = fused[:, :dp]                                      # lane-aligned split
    h = fused[:, dp:] + b1_ref[...]

    # ---- pairwise attention softmax over the feature axis ----
    if valid_d < dp:                 # static gate: only when D needed padding
        col_valid = jax.lax.broadcasted_iota(jnp.int32, (1, dp), 1) < valid_d
        scores = jnp.where(col_valid, scores, jnp.float32(-1e30))
    scores = scores - jnp.max(scores, axis=-1, keepdims=True)
    e = jnp.exp(scores)
    # Exact divide: pam sums squares of these over the whole batch.
    coeffs = e / jnp.sum(e, axis=-1, keepdims=True)

    if valid_b < padded_b:           # static gate: only when B needed padding
        row_ids = (c * steps_per_core + i) * batch_tile + \
            jax.lax.broadcasted_iota(jnp.int32, (batch_tile, 1), 0)
        coeffs = jnp.where(row_ids < valid_b, coeffs, 0.0)
    coeffs_m = coeffs.astype(jnp.bfloat16)

    @pl.when(i == 0)
    def _init_pam():
        pam_ref[...] = jnp.zeros_like(pam_ref)

    # coeffs^T @ coeffs: contract over the batch axis of both operands directly
    # (no explicit .T -> no XLU transpose/relayout before the MXU push).
    pam_ref[...] += jax.lax.dot_general(
        coeffs_m, coeffs_m,
        dimension_numbers=(((0,), (0,)), ((), ())),
        preferred_element_type=jnp.float32)[None]

    # ---- encoder (layer-1 pre-act came from the fused matmul) + decoder ----
    h = jnp.maximum(h, 0.0).astype(jnp.bfloat16)
    h = jnp.dot(h, w2_ref[...], preferred_element_type=jnp.float32) + b2_ref[...]
    h = jnp.maximum(h, 0.0).astype(jnp.bfloat16)
    h = jnp.dot(h, w3_ref[...], preferred_element_type=jnp.float32) + b3_ref[...]
    h = jnp.maximum(h, 0.0).astype(jnp.bfloat16)
    out = jnp.dot(h, w4_ref[...], preferred_element_type=jnp.float32) + b4_ref[...]
    # Sigmoid; approx EUP reciprocal is fine for the reconstruction output.
    # TODO(synk): emit rec as bf16 if downstream tolerates it (halves writeback).
    rec_ref[...] = pl.reciprocal(1.0 + jnp.exp(-out), approx=True)


def dual_attention_autoencoder(x, params, *, batch_tile=512):
    """x: (B, D) float32. params: dict of pre-transposed (in, out) weights."""
    B, D = x.shape
    H = params["w1"].shape[1]
    Hh = params["w2"].shape[1]

    Dp = _round_up(D, 128)
    Hp = _round_up(H, 128)
    Hhp = _round_up(Hh, 128)

    # bf16 x tiles -> 16 rows per packed vreg sublane group.
    TB = min(_round_up(batch_tile, 16), _round_up(B, 16))
    tiles = pl.cdiv(B, TB)
    num_par = 2 if tiles >= 2 else 1   # v7x: split across 2 TCs; loop on 1-TC chips
    steps = pl.cdiv(tiles, num_par)
    Bp = num_par * steps * TB

    f32, bf16 = jnp.float32, jnp.bfloat16

    # Host-side constant folding: pfc = softmax(pf_w); fold into w1.
    pfc = jax.nn.softmax(params["pf_w"].astype(f32), axis=0)            # (D,)
    w1_scaled = pfc[:, None] * params["w1"].astype(f32)                 # (D, H)

    x_p = _pad2(x.astype(f32), Bp, Dp).astype(bf16)
    wp_p = _pad2(params["w_pair"].astype(f32), Dp, Dp)
    w1_p = _pad2(w1_scaled, Dp, Hp)
    wfused = jnp.concatenate([wp_p, w1_p], axis=1).astype(bf16)         # (Dp, Dp+Hp)
    b1_p = _pad2(params["b1"].reshape(1, H).astype(f32), 1, Hp)
    w2_p = _pad2(params["w2"], Hp, Hhp).astype(bf16)
    b2_p = _pad2(params["b2"].reshape(1, Hh).astype(f32), 1, Hhp)
    w3_p = _pad2(params["w3"], Hhp, Hp).astype(bf16)
    b3_p = _pad2(params["b3"].reshape(1, H).astype(f32), 1, Hp)
    w4_p = _pad2(params["w4"], Hp, Dp).astype(bf16)
    b4_p = _pad2(params["b4"].reshape(1, D).astype(f32), 1, Dp)

    operands = (x_p, wfused, b1_p, w2_p, b2_p, w3_p, b3_p, w4_p, b4_p)

    # VMEM budget: large on 128 MiB chips (v5e/v6e), conservative on v7x (64 MiB).
    try:
        vmem_cap = int(pltpu.get_tpu_info().vmem_capacity_bytes)
    except Exception:
        vmem_cap = 64 * 1024 * 1024
    vmem_limit = min(max(vmem_cap - 16 * 1024 * 1024, 32 * 1024 * 1024),
                     100 * 1024 * 1024)

    flops = (2 * Bp * Dp * (Dp + Hp)          # fused scores + encoder-1
             + 2 * Bp * Dp * Dp               # pam accumulation
             + 2 * Bp * Hp * Hhp + 2 * Bp * Hhp * Hp + 2 * Bp * Hp * Dp)
    transcendentals = 2 * Bp * Dp
    bytes_accessed = (sum(int(o.size) * o.dtype.itemsize for o in operands)
                      + 4 * (Bp * Dp + num_par * Dp * Dp))

    kernel = functools.partial(
        _dual_attention_ae_kernel,
        valid_d=D, valid_b=B, padded_b=Bp, batch_tile=TB, steps_per_core=steps)

    def build(weight_buffer_count):
        if weight_buffer_count is None:
            const = lambda shape: pl.BlockSpec(shape, lambda c, i: (0, 0))
        else:
            # Grid-invariant blocks: single-buffered -> no 2x VMEM for weights.
            const = lambda shape: pl.BlockSpec(
                shape, lambda c, i: (0, 0),
                pipeline_mode=pl.Buffered(weight_buffer_count))
        in_specs = [
            pl.BlockSpec((TB, Dp), lambda c, i: (c * steps + i, 0)),  # x tile (bf16)
            const((Dp, Dp + Hp)),                       # [wp | pf*w1]
            const((1, Hp)),                             # b1
            const((Hp, Hhp)), const((1, Hhp)),          # w2, b2
            const((Hhp, Hp)), const((1, Hp)),           # w3, b3
            const((Hp, Dp)), const((1, Dp)),            # w4, b4
        ]
        out_specs = (
            pl.BlockSpec((TB, Dp), lambda c, i: (c * steps + i, 0)),  # rec
            pl.BlockSpec((1, Dp, Dp), lambda c, i: (c, 0, 0)),        # pam partials
        )
        out_shape = (
            jax.ShapeDtypeStruct((Bp, Dp), f32),
            jax.ShapeDtypeStruct((num_par, Dp, Dp), f32),
        )
        return pl.pallas_call(
            kernel,
            grid=(num_par, steps),
            in_specs=in_specs,
            out_specs=out_specs,
            out_shape=out_shape,
            compiler_params=pltpu.CompilerParams(
                dimension_semantics=("parallel", "arbitrary"),
                vmem_limit_bytes=vmem_limit),
            cost_estimate=pl.CostEstimate(
                flops=flops, transcendentals=transcendentals,
                bytes_accessed=bytes_accessed),
        )

    try:
        rec, pam = jax.block_until_ready(build(1)(*operands))
    except Exception:
        # This jax build rejects pipeline_mode=pl.Buffered(1): default buffering.
        rec, pam = jax.block_until_ready(build(None)(*operands))

    pam_full = pam.sum(axis=0)                       # tiny Dp x Dp host-side reduce
    return rec[:B, :D], pam_full[:D, :D], pfc


def init_params(key, input_dim, hidden_dim):
    """Deterministic synthetic init mirroring the PyTorch module's shapes.

    nn.Linear(in, out) weights are (out, in) in PyTorch; stored transposed as
    (in, out) so the kernel does x @ W + b.
    """
    ks = jax.random.split(key, 10)
    D, H = input_dim, hidden_dim
    Hh = H // 2

    bound_p = (6.0 / (D + D)) ** 0.5
    w_pair = jax.random.uniform(ks[0], (D, D), jnp.float32, -bound_p, bound_p)
    pf_w = jax.random.uniform(ks[1], (D,), jnp.float32, 0.0, 1.0)

    def linear(k, fan_in, fan_out):
        kw, kb = jax.random.split(k)
        bound = 1.0 / (fan_in ** 0.5)
        w = jax.random.uniform(kw, (fan_in, fan_out), jnp.float32, -bound, bound)
        b = jax.random.uniform(kb, (fan_out,), jnp.float32, -bound, bound)
        return w, b

    w1, b1 = linear(ks[2], D, H)
    w2, b2 = linear(ks[3], H, Hh)
    w3, b3 = linear(ks[4], Hh, H)
    w4, b4 = linear(ks[5], H, D)

    return dict(w_pair=w_pair, pf_w=pf_w,
                w1=w1, b1=b1, w2=w2, b2=b2,
                w3=w3, b3=b3, w4=w4, b4=b4)


def reference_forward(x, params):
    """Pure-JAX f32 reference of the PyTorch forward."""
    scores = x @ params["w_pair"]
    coeffs = jax.nn.softmax(scores, axis=-1)
    pam = coeffs.T @ coeffs
    pfc = jax.nn.softmax(params["pf_w"], axis=0)
    att = x * pfc
    h = jax.nn.relu(att @ params["w1"] + params["b1"])
    h = jax.nn.relu(h @ params["w2"] + params["b2"])
    h = jax.nn.relu(h @ params["w3"] + params["b3"])
    rec = jax.nn.sigmoid(h @ params["w4"] + params["b4"])
    return rec, pam, pfc


if __name__ == "__main__":
    D, H = 16, 32
    key = jax.random.PRNGKey(0)
    kx1, kx2, kp = jax.random.split(key, 3)
    params = init_params(kp, D, H)

    # Single-tile case (B=8 -> 1 core split, 1 batch step).
    x1 = jax.random.normal(kx1, (8, D), jnp.float32)
    rec, pam, pfc = dual_attention_autoencoder(x1, params)
    jax.block_until_ready((rec, pam, pfc))
    rec_r, pam_r, pfc_r = reference_forward(x1, params)
    assert rec.shape == (8, D) and pam.shape == (D, D) and pfc.shape == (D,)
    # bf16 MXU inputs + approx sigmoid reciprocal => relaxed tolerances vs f32 ref.
    assert jnp.allclose(rec, rec_r, atol=2e-2), "reconstruction mismatch (B=8)"
    assert jnp.allclose(pam, pam_r, rtol=2e-2, atol=2e-2), "pairwise matrix mismatch (B=8)"
    assert jnp.allclose(pfc, pfc_r, atol=1e-5), "per-feature coeffs mismatch (B=8)"

    # Multi-tile case: B=40, batch_tile=16 -> grid (2 parallel, 2 arbitrary);
    # exercises pl.when init, per-core pam accumulation + host-side partial sum,
    # and padded-row masking (rows 40..63 are padding).
    x2 = jax.random.normal(kx2, (40, D), jnp.float32)
    rec2, pam2, pfc2 = dual_attention_autoencoder(x2, params, batch_tile=16)
    jax.block_until_ready((rec2, pam2, pfc2))
    rec2_r, pam2_r, pfc2_r = reference_forward(x2, params)
    assert rec2.shape == (40, D) and pam2.shape == (D, D)
    assert jnp.allclose(rec2, rec2_r, atol=2e-2), "reconstruction mismatch (B=40)"
    assert jnp.allclose(pam2, pam2_r, rtol=2e-2, atol=2e-2), "pairwise matrix mismatch (B=40)"
    assert jnp.allclose(pfc2, pfc2_r, atol=1e-5), "per-feature coeffs mismatch (B=40)"

    print("KERNEL_OK")
</pallas_src>

<mosaic_0001>
module attributes {stable_mosaic.version = 11 : i64} {
  func.func @_dual_attention_ae_kernel(%arg0: i32, %arg1: i32, %arg2: memref<16x128xbf16, #tpu.memory_space<vmem>>, %arg3: memref<128x256xbf16, #tpu.memory_space<vmem>>, %arg4: memref<1x128xf32, #tpu.memory_space<vmem>>, %arg5: memref<128x128xbf16, #tpu.memory_space<vmem>>, %arg6: memref<1x128xf32, #tpu.memory_space<vmem>>, %arg7: memref<128x128xbf16, #tpu.memory_space<vmem>>, %arg8: memref<1x128xf32, #tpu.memory_space<vmem>>, %arg9: memref<128x128xbf16, #tpu.memory_space<vmem>>, %arg10: memref<1x128xf32, #tpu.memory_space<vmem>>, %arg11: memref<16x128xf32, #tpu.memory_space<vmem>>, %arg12: memref<1x128x128xf32, #tpu.memory_space<vmem>>) attributes {dimension_semantics = [#tpu.dimension_semantics<parallel>, #tpu.dimension_semantics<arbitrary>], iteration_bounds = array<i64: 1, 1>, scalar_prefetch = 0 : i64, scratch_operands = 0 : i64, tpu.core_type = #tpu.core_type<tc>, window_params = [{transform_indices = @transform_0, window_bounds = array<i64: 16, 128>}, {pipeline_mode = #tpu.pipeline_mode<synchronous>, transform_indices = @transform_1, window_bounds = array<i64: 128, 256>}, {pipeline_mode = #tpu.pipeline_mode<synchronous>, transform_indices = @transform_2, window_bounds = array<i64: 1, 128>}, {pipeline_mode = #tpu.pipeline_mode<synchronous>, transform_indices = @transform_3, window_bounds = array<i64: 128, 128>}, {pipeline_mode = #tpu.pipeline_mode<synchronous>, transform_indices = @transform_4, window_bounds = array<i64: 1, 128>}, {pipeline_mode = #tpu.pipeline_mode<synchronous>, transform_indices = @transform_5, window_bounds = array<i64: 128, 128>}, {pipeline_mode = #tpu.pipeline_mode<synchronous>, transform_indices = @transform_6, window_bounds = array<i64: 1, 128>}, {pipeline_mode = #tpu.pipeline_mode<synchronous>, transform_indices = @transform_7, window_bounds = array<i64: 128, 128>}, {pipeline_mode = #tpu.pipeline_mode<synchronous>, transform_indices = @transform_8, window_bounds = array<i64: 1, 128>}, {transform_indices = @transform_9, window_bounds = array<i64: 16, 128>}, {transform_indices = @transform_10, window_bounds = array<i64: 1, 128, 128>}]} {
    %c0 = arith.constant 0 : index
    %c0_0 = arith.constant 0 : index
    %0 = vector.load %arg2[%c0, %c0_0] : memref<16x128xbf16, #tpu.memory_space<vmem>>, vector<16x128xbf16>
    %c0_1 = arith.constant 0 : index
    %c0_2 = arith.constant 0 : index
    %1 = vector.load %arg3[%c0_1, %c0_2] : memref<128x256xbf16, #tpu.memory_space<vmem>>, vector<128x256xbf16>
    %cst = arith.constant dense<0.000000e+00> : vector<16x256xf32>
    %2 = tpu.matmul %0, %1, %cst {dimension_numbers = #tpu.dot_dimension_numbers<[1], [0], [0], [1], [0, 0, 1, 1], [], []>} : vector<16x128xbf16>, vector<128x256xbf16>, vector<16x256xf32> -> vector<16x256xf32>
    %3 = vector.extract_strided_slice %2 {offsets = [0, 0], sizes = [16, 128], strides = [1, 1]} : vector<16x256xf32> to vector<16x128xf32>
    %4 = vector.extract_strided_slice %2 {offsets = [0, 128], sizes = [16, 128], strides = [1, 1]} : vector<16x256xf32> to vector<16x128xf32>
    %c0_3 = arith.constant 0 : index
    %c0_4 = arith.constant 0 : index
    %5 = vector.load %arg4[%c0_3, %c0_4] : memref<1x128xf32, #tpu.memory_space<vmem>>, vector<1x128xf32>
    %6 = vector.broadcast %5 : vector<1x128xf32> to vector<16x128xf32>
    %7 = arith.addf %4, %6 : vector<16x128xf32>
    %8 = tpu.iota {dimensions = array<i32: 1>} : vector<1x128xi32>
    %c16_i32 = arith.constant 16 : i32
    %9 = vector.broadcast %c16_i32 : i32 to vector<1x128xi32>
    %10 = arith.cmpi slt, %8, %9 : vector<1x128xi32>
    %cst_5 = arith.constant -1.000000e+30 : f32
    %11 = vector.shape_cast %10 : vector<1x128xi1> to vector<1x128xi1>
    %12 = vector.broadcast %11 : vector<1x128xi1> to vector<16x128xi1>
    %13 = vector.broadcast %cst_5 : f32 to vector<16x128xf32>
    %14 = arith.select %12, %3, %13 : vector<16x128xi1>, vector<16x128xf32>
    %cst_6 = arith.constant dense<0xFF800000> : vector<16xf32>
    %15 = vector.multi_reduction <maximumf>, %14, %cst_6 [1] : vector<16x128xf32> to vector<16xf32>
    %16 = vector.shape_cast %15 : vector<16xf32> to vector<16x1xf32>
    %17 = vector.broadcast %16 : vector<16x1xf32> to vector<16x128xf32>
    %18 = arith.subf %14, %17 : vector<16x128xf32>
    %19 = math.exp %18 : vector<16x128xf32>
    %cst_7 = arith.constant dense<0.000000e+00> : vector<16xf32>
    %20 = vector.multi_reduction <add>, %19, %cst_7 [1] : vector<16x128xf32> to vector<16xf32>
    %21 = vector.shape_cast %20 : vector<16xf32> to vector<16x1xf32>
    %22 = vector.broadcast %21 : vector<16x1xf32> to vector<16x128xf32>
    %23 = arith.divf %19, %22 : vector<16x128xf32>
    %c1_i32 = arith.constant 1 : i32
    %24 = arith.muli %arg0, %c1_i32 : i32
    %25 = arith.addi %24, %arg1 : i32
    %c16_i32_8 = arith.constant 16 : i32
    %26 = arith.muli %25, %c16_i32_8 : i32
    %27 = tpu.iota {dimensions = array<i32: 0>} : vector<16x1xi32>
    %28 = vector.broadcast %26 : i32 to vector<16x1xi32>
    %29 = arith.addi %28, %27 : vector<16x1xi32>
    %c8_i32 = arith.constant 8 : i32
    %30 = vector.broadcast %c8_i32 : i32 to vector<16x1xi32>
    %31 = arith.cmpi slt, %29, %30 : vector<16x1xi32>
    %cst_9 = arith.constant 0.000000e+00 : f32
    %32 = vector.shape_cast %31 : vector<16x1xi1> to vector<16x1xi1>
    %33 = vector.broadcast %32 : vector<16x1xi1> to vector<16x128xi1>
    %34 = vector.broadcast %cst_9 : f32 to vector<16x128xf32>
    %35 = arith.select %33, %23, %34 : vector<16x128xi1>, vector<16x128xf32>
    %36 = arith.truncf %35 : vector<16x128xf32> to vector<16x128xbf16>
    %c0_i32 = arith.constant 0 : i32
    %37 = arith.cmpi eq, %arg1, %c0_i32 : i32
    %38 = arith.extui %37 : i1 to i32
    %c0_i32_10 = arith.constant 0 : i32
    %39 = arith.cmpi ne, %38, %c0_i32_10 : i32
    scf.if %39 {
      %cst_40 = arith.constant 0.000000e+00 : f32
      %76 = vector.broadcast %cst_40 : f32 to vector<1x128x128xf32>
      %c0_41 = arith.constant 0 : index
      %c0_42 = arith.constant 0 : index
      %c0_43 = arith.constant 0 : index
      %77 = vector.load %arg12[%c0_41, %c0_42, %c0_43] : memref<1x128x128xf32, #tpu.memory_space<vmem>>, vector<1x128x128xf32>
      tpu.vector_store %arg12[%c0_41, %c0_42, %c0_43], %76 {strides = array<i32>} : memref<1x128x128xf32, #tpu.memory_space<vmem>>, vector<1x128x128xf32>,
    } else {
    }
    %c0_11 = arith.constant 0 : index
    %c0_12 = arith.constant 0 : index
    %c0_13 = arith.constant 0 : index
    %40 = vector.load %arg12[%c0_11, %c0_12, %c0_13] : memref<1x128x128xf32, #tpu.memory_space<vmem>>, vector<1x128x128xf32>
    %cst_14 = arith.constant dense<0.000000e+00> : vector<128x128xf32>
    %41 = tpu.matmul %36, %36, %cst_14 {dimension_numbers = #tpu.dot_dimension_numbers<[0], [0], [1], [1], [0, 1, 1, 1], [], []>} : vector<16x128xbf16>, vector<16x128xbf16>, vector<128x128xf32> -> vector<128x128xf32>
    %42 = vector.shape_cast %41 : vector<128x128xf32> to vector<1x128x128xf32>
    %43 = arith.addf %40, %42 : vector<1x128x128xf32>
    %c0_15 = arith.constant 0 : index
    %c0_16 = arith.constant 0 : index
    %c0_17 = arith.constant 0 : index
    %44 = vector.load %arg12[%c0_15, %c0_16, %c0_17] : memref<1x128x128xf32, #tpu.memory_space<vmem>>, vector<1x128x128xf32>
    tpu.vector_store %arg12[%c0_15, %c0_16, %c0_17], %43 {strides = array<i32>} : memref<1x128x128xf32, #tpu.memory_space<vmem>>, vector<1x128x128xf32>,
    %cst_18 = arith.constant 0.000000e+00 : f32
    %45 = vector.broadcast %cst_18 : f32 to vector<16x128xf32>
    %46 = arith.maximumf %7, %45 : vector<16x128xf32>
    %47 = arith.truncf %46 : vector<16x128xf32> to vector<16x128xbf16>
    %c0_19 = arith.constant 0 : index
    %c0_20 = arith.constant 0 : index
    %48 = vector.load %arg5[%c0_19, %c0_20] : memref<128x128xbf16, #tpu.memory_space<vmem>>, vector<128x128xbf16>
    %cst_21 = arith.constant dense<0.000000e+00> : vector<16x128xf32>
    %49 = tpu.matmul %47, %48, %cst_21 {dimension_numbers = #tpu.dot_dimension_numbers<[1], [0], [0], [1], [0, 0, 1, 1], [], []>} : vector<16x128xbf16>, vector<128x128xbf16>, vector<16x128xf32> -> vector<16x128xf32>
    %c0_22 = arith.constant 0 : index
    %c0_23 = arith.constant 0 : index
    %50 = vector.load %arg6[%c0_22, %c0_23] : memref<1x128xf32, #tpu.memory_space<vmem>>, vector<1x128xf32>
    %51 = vector.broadcast %50 : vector<1x128xf32> to vector<16x128xf32>
    %52 = arith.addf %49, %51 : vector<16x128xf32>
    %cst_24 = arith.constant 0.000000e+00 : f32
    %53 = vector.broadcast %cst_24 : f32 to vector<16x128xf32>
    %54 = arith.maximumf %52, %53 : vector<16x128xf32>
    %55 = arith.truncf %54 : vector<16x128xf32> to vector<16x128xbf16>
    %c0_25 = arith.constant 0 : index
    %c0_26 = arith.constant 0 : index
    %56 = vector.load %arg7[%c0_25, %c0_26] : memref<128x128xbf16, #tpu.memory_space<vmem>>, vector<128x128xbf16>
    %cst_27 = arith.constant dense<0.000000e+00> : vector<16x128xf32>
    %57 = tpu.matmul %55, %56, %cst_27 {dimension_numbers = #tpu.dot_dimension_numbers<[1], [0], [0], [1], [0, 0, 1, 1], [], []>} : vector<16x128xbf16>, vector<128x128xbf16>, vector<16x128xf32> -> vector<16x128xf32>
    %c0_28 = arith.constant 0 : index
    %c0_29 = arith.constant 0 : index
    %58 = vector.load %arg8[%c0_28, %c0_29] : memref<1x128xf32, #tpu.memory_space<vmem>>, vector<1x128xf32>
    %59 = vector.broadcast %58 : vector<1x128xf32> to vector<16x128xf32>
    %60 = arith.addf %57, %59 : vector<16x128xf32>
    %cst_30 = arith.constant 0.000000e+00 : f32
    %61 = vector.broadcast %cst_30 : f32 to vector<16x128xf32>
    %62 = arith.maximumf %60, %61 : vector<16x128xf32>
    %63 = arith.truncf %62 : vector<16x128xf32> to vector<16x128xbf16>
    %c0_31 = arith.constant 0 : index
    %c0_32 = arith.constant 0 : index
    %64 = vector.load %arg9[%c0_31, %c0_32] : memref<128x128xbf16, #tpu.memory_space<vmem>>, vector<128x128xbf16>
    %cst_33 = arith.constant dense<0.000000e+00> : vector<16x128xf32>
    %65 = tpu.matmul %63, %64, %cst_33 {dimension_numbers = #tpu.dot_dimension_numbers<[1], [0], [0], [1], [0, 0, 1, 1], [], []>} : vector<16x128xbf16>, vector<128x128xbf16>, vector<16x128xf32> -> vector<16x128xf32>
    %c0_34 = arith.constant 0 : index
    %c0_35 = arith.constant 0 : index
    %66 = vector.load %arg10[%c0_34, %c0_35] : memref<1x128xf32, #tpu.memory_space<vmem>>, vector<1x128xf32>
    %67 = vector.broadcast %66 : vector<1x128xf32> to vector<16x128xf32>
    %68 = arith.addf %65, %67 : vector<16x128xf32>
    %cst_36 = arith.constant 0.000000e+00 : f32
    %69 = vector.broadcast %cst_36 : f32 to vector<16x128xf32>
    %70 = arith.subf %69, %68 : vector<16x128xf32>
    %71 = math.exp %70 : vector<16x128xf32>
    %cst_37 = arith.constant 1.000000e+00 : f32
    %72 = vector.broadcast %cst_37 : f32 to vector<16x128xf32>
    %73 = arith.addf %72, %71 : vector<16x128xf32>
    %74 = tpu.reciprocal %73 {approx = true} : vector<16x128xf32> -> vector<16x128xf32>
    %c0_38 = arith.constant 0 : index
    %c0_39 = arith.constant 0 : index
    %75 = vector.load %arg11[%c0_38, %c0_39] : memref<16x128xf32, #tpu.memory_space<vmem>>, vector<16x128xf32>
    tpu.vector_store %arg11[%c0_38, %c0_39], %74 {strides = array<i32>} : memref<16x128xf32, #tpu.memory_space<vmem>>, vector<16x128xf32>,
    return
  }
  func.func @transform_0(%arg0: i32, %arg1: i32) -> (i32, i32) {
    %c1_i32 = arith.constant 1 : i32
    %0 = arith.muli %arg0, %c1_i32 : i32
    %1 = arith.addi %0, %arg1 : i32
    %c0_i32 = arith.constant 0 : i32
    %c0_i32_0 = arith.constant 0 : i32
    return %1, %c0_i32 : i32, i32
  }
  func.func @transform_1(%arg0: i32, %arg1: i32) -> (i32, i32) {
    %c0_i32 = arith.constant 0 : i32
    %c0_i32_0 = arith.constant 0 : i32
    %c0_i32_1 = arith.constant 0 : i32
    return %c0_i32, %c0_i32_0 : i32, i32
  }
  func.func @transform_2(%arg0: i32, %arg1: i32) -> (i32, i32) {
    %c0_i32 = arith.constant 0 : i32
    %c0_i32_0 = arith.constant 0 : i32
    %c0_i32_1 = arith.constant 0 : i32
    return %c0_i32, %c0_i32_0 : i32, i32
  }
  func.func @transform_3(%arg0: i32, %arg1: i32) -> (i32, i32) {
    %c0_i32 = arith.constant 0 : i32
    %c0_i32_0 = arith.constant 0 : i32
    %c0_i32_1 = arith.constant 0 : i32
    return %c0_i32, %c0_i32_0 : i32, i32
  }
  func.func @transform_4(%arg0: i32, %arg1: i32) -> (i32, i32) {
    %c0_i32 = arith.constant 0 : i32
    %c0_i32_0 = arith.constant 0 : i32
    %c0_i32_1 = arith.constant 0 : i32
    return %c0_i32, %c0_i32_0 : i32, i32
  }
  func.func @transform_5(%arg0: i32, %arg1: i32) -> (i32, i32) {
    %c0_i32 = arith.constant 0 : i32
    %c0_i32_0 = arith.constant 0 : i32
    %c0_i32_1 = arith.constant 0 : i32
    return %c0_i32, %c0_i32_0 : i32, i32
  }
  func.func @transform_6(%arg0: i32, %arg1: i32) -> (i32, i32) {
    %c0_i32 = arith.constant 0 : i32
    %c0_i32_0 = arith.constant 0 : i32
    %c0_i32_1 = arith.constant 0 : i32
    return %c0_i32, %c0_i32_0 : i32, i32
  }
  func.func @transform_7(%arg0: i32, %arg1: i32) -> (i32, i32) {
    %c0_i32 = arith.constant 0 : i32
    %c0_i32_0 = arith.constant 0 : i32
    %c0_i32_1 = arith.constant 0 : i32
    return %c0_i32, %c0_i32_0 : i32, i32
  }
  func.func @transform_8(%arg0: i32, %arg1: i32) -> (i32, i32) {
    %c0_i32 = arith.constant 0 : i32
    %c0_i32_0 = arith.constant 0 : i32
    %c0_i32_1 = arith.constant 0 : i32
    return %c0_i32, %c0_i32_0 : i32, i32
  }
  func.func @transform_9(%arg0: i32, %arg1: i32) -> (i32, i32) {
    %c1_i32 = arith.constant 1 : i32
    %0 = arith.muli %arg0, %c1_i32 : i32
    %1 = arith.addi %0, %arg1 : i32
    %c0_i32 = arith.constant 0 : i32
    %c0_i32_0 = arith.constant 0 : i32
    return %1, %c0_i32 : i32, i32
  }
  func.func @transform_10(%arg0: i32, %arg1: i32) -> (i32, i32, i32) {
    %c0_i32 = arith.constant 0 : i32
    %c0_i32_0 = arith.constant 0 : i32
    %c0_i32_1 = arith.constant 0 : i32
    return %arg0, %c0_i32, %c0_i32_0 : i32, i32, i32
  }
}

module attributes {stable_mosaic.version = 11 : i64} {
  func.func @_dual_attention_ae_kernel(%arg0: i32, %arg1: i32, %arg2: memref<16x128xbf16, #tpu.memory_space<vmem>>, %arg3: memref<128x256xbf16, #tpu.memory_space<vmem>>, %arg4: memref<1x128xf32, #tpu.memory_space<vmem>>, %arg5: memref<128x128xbf16, #tpu.memory_space<vmem>>, %arg6: memref<1x128xf32, #tpu.memory_space<vmem>>, %arg7: memref<128x128xbf16, #tpu.memory_space<vmem>>, %arg8: memref<1x128xf32, #tpu.memory_space<vmem>>, %arg9: memref<128x128xbf16, #tpu.memory_space<vmem>>, %arg10: memref<1x128xf32, #tpu.memory_space<vmem>>, %arg11: memref<16x128xf32, #tpu.memory_space<vmem>>, %arg12: memref<1x128x128xf32, #tpu.memory_space<vmem>>) attributes {dimension_semantics = [#tpu.dimension_semantics<parallel>, #tpu.dimension_semantics<arbitrary>], iteration_bounds = array<i64: 1, 1>, scalar_prefetch = 0 : i64, scratch_operands = 0 : i64, tpu.core_type = #tpu.core_type<tc>, window_params = [{transform_indices = @transform_0, window_bounds = array<i64: 16, 128>}, {pipeline_mode = #tpu.pipeline_mode<synchronous>, transform_indices = @transform_1, window_bounds = array<i64: 128, 256>}, {pipeline_mode = #tpu.pipeline_mode<synchronous>, transform_indices = @transform_2, window_bounds = array<i64: 1, 128>}, {pipeline_mode = #tpu.pipeline_mode<synchronous>, transform_indices = @transform_3, window_bounds = array<i64: 128, 128>}, {pipeline_mode = #tpu.pipeline_mode<synchronous>, transform_indices = @transform_4, window_bounds = array<i64: 1, 128>}, {pipeline_mode = #tpu.pipeline_mode<synchronous>, transform_indices = @transform_5, window_bounds = array<i64: 128, 128>}, {pipeline_mode = #tpu.pipeline_mode<synchronous>, transform_indices = @transform_6, window_bounds = array<i64: 1, 128>}, {pipeline_mode = #tpu.pipeline_mode<synchronous>, transform_indices = @transform_7, window_bounds = array<i64: 128, 128>}, {pipeline_mode = #tpu.pipeline_mode<synchronous>, transform_indices = @transform_8, window_bounds = array<i64: 1, 128>}, {transform_indices = @transform_9, window_bounds = array<i64: 16, 128>}, {transform_indices = @transform_10, window_bounds = array<i64: 1, 128, 128>}]} {
    %c0 = arith.constant 0 : index
    %c0_0 = arith.constant 0 : index
    %0 = vector.load %arg2[%c0, %c0_0] : memref<16x128xbf16, #tpu.memory_space<vmem>>, vector<16x128xbf16>
    %c0_1 = arith.constant 0 : index
    %c0_2 = arith.constant 0 : index
    %1 = vector.load %arg3[%c0_1, %c0_2] : memref<128x256xbf16, #tpu.memory_space<vmem>>, vector<128x256xbf16>
    %cst = arith.constant dense<0.000000e+00> : vector<16x256xf32>
    %2 = tpu.matmul %0, %1, %cst {dimension_numbers = #tpu.dot_dimension_numbers<[1], [0], [0], [1], [0, 0, 1, 1], [], []>} : vector<16x128xbf16>, vector<128x256xbf16>, vector<16x256xf32> -> vector<16x256xf32>
    %3 = vector.extract_strided_slice %2 {offsets = [0, 0], sizes = [16, 128], strides = [1, 1]} : vector<16x256xf32> to vector<16x128xf32>
    %4 = vector.extract_strided_slice %2 {offsets = [0, 128], sizes = [16, 128], strides = [1, 1]} : vector<16x256xf32> to vector<16x128xf32>
    %c0_3 = arith.constant 0 : index
    %c0_4 = arith.constant 0 : index
    %5 = vector.load %arg4[%c0_3, %c0_4] : memref<1x128xf32, #tpu.memory_space<vmem>>, vector<1x128xf32>
    %6 = vector.broadcast %5 : vector<1x128xf32> to vector<16x128xf32>
    %7 = arith.addf %4, %6 : vector<16x128xf32>
    %8 = tpu.iota {dimensions = array<i32: 1>} : vector<1x128xi32>
    %c16_i32 = arith.constant 16 : i32
    %9 = vector.broadcast %c16_i32 : i32 to vector<1x128xi32>
    %10 = arith.cmpi slt, %8, %9 : vector<1x128xi32>
    %cst_5 = arith.constant -1.000000e+30 : f32
    %11 = vector.shape_cast %10 : vector<1x128xi1> to vector<1x128xi1>
    %12 = vector.broadcast %11 : vector<1x128xi1> to vector<16x128xi1>
    %13 = vector.broadcast %cst_5 : f32 to vector<16x128xf32>
    %14 = arith.select %12, %3, %13 : vector<16x128xi1>, vector<16x128xf32>
    %cst_6 = arith.constant dense<0xFF800000> : vector<16xf32>
    %15 = vector.multi_reduction <maximumf>, %14, %cst_6 [1] : vector<16x128xf32> to vector<16xf32>
    %16 = vector.shape_cast %15 : vector<16xf32> to vector<16x1xf32>
    %17 = vector.broadcast %16 : vector<16x1xf32> to vector<16x128xf32>
    %18 = arith.subf %14, %17 : vector<16x128xf32>
    %19 = math.exp %18 : vector<16x128xf32>
    %cst_7 = arith.constant dense<0.000000e+00> : vector<16xf32>
    %20 = vector.multi_reduction <add>, %19, %cst_7 [1] : vector<16x128xf32> to vector<16xf32>
    %21 = vector.shape_cast %20 : vector<16xf32> to vector<16x1xf32>
    %22 = vector.broadcast %21 : vector<16x1xf32> to vector<16x128xf32>
    %23 = arith.divf %19, %22 : vector<16x128xf32>
    %c1_i32 = arith.constant 1 : i32
    %24 = arith.muli %arg0, %c1_i32 : i32
    %25 = arith.addi %24, %arg1 : i32
    %c16_i32_8 = arith.constant 16 : i32
    %26 = arith.muli %25, %c16_i32_8 : i32
    %27 = tpu.iota {dimensions = array<i32: 0>} : vector<16x1xi32>
    %28 = vector.broadcast %26 : i32 to vector<16x1xi32>
    %29 = arith.addi %28, %27 : vector<16x1xi32>
    %c8_i32 = arith.constant 8 : i32
    %30 = vector.broadcast %c8_i32 : i32 to vector<16x1xi32>
    %31 = arith.cmpi slt, %29, %30 : vector<16x1xi32>
    %cst_9 = arith.constant 0.000000e+00 : f32
    %32 = vector.shape_cast %31 : vector<16x1xi1> to vector<16x1xi1>
    %33 = vector.broadcast %32 : vector<16x1xi1> to vector<16x128xi1>
    %34 = vector.broadcast %cst_9 : f32 to vector<16x128xf32>
    %35 = arith.select %33, %23, %34 : vector<16x128xi1>, vector<16x128xf32>
    %36 = arith.truncf %35 : vector<16x128xf32> to vector<16x128xbf16>
    %c0_i32 = arith.constant 0 : i32
    %37 = arith.cmpi eq, %arg1, %c0_i32 : i32
    %38 = arith.extui %37 : i1 to i32
    %c0_i32_10 = arith.constant 0 : i32
    %39 = arith.cmpi ne, %38, %c0_i32_10 : i32
    scf.if %39 {
      %cst_40 = arith.constant 0.000000e+00 : f32
      %76 = vector.broadcast %cst_40 : f32 to vector<1x128x128xf32>
      %c0_41 = arith.constant 0 : index
      %c0_42 = arith.constant 0 : index
      %c0_43 = arith.constant 0 : index
      %77 = vector.load %arg12[%c0_41, %c0_42, %c0_43] : memref<1x128x128xf32, #tpu.memory_space<vmem>>, vector<1x128x128xf32>
      tpu.vector_store %arg12[%c0_41, %c0_42, %c0_43], %76 {strides = array<i32>} : memref<1x128x128xf32, #tpu.memory_space<vmem>>, vector<1x128x128xf32>,
    } else {
    }
    %c0_11 = arith.constant 0 : index
    %c0_12 = arith.constant 0 : index
    %c0_13 = arith.constant 0 : index
    %40 = vector.load %arg12[%c0_11, %c0_12, %c0_13] : memref<1x128x128xf32, #tpu.memory_space<vmem>>, vector<1x128x128xf32>
    %cst_14 = arith.constant dense<0.000000e+00> : vector<128x128xf32>
    %41 = tpu.matmul %36, %36, %cst_14 {dimension_numbers = #tpu.dot_dimension_numbers<[0], [0], [1], [1], [0, 1, 1, 1], [], []>} : vector<16x128xbf16>, vector<16x128xbf16>, vector<128x128xf32> -> vector<128x128xf32>
    %42 = vector.shape_cast %41 : vector<128x128xf32> to vector<1x128x128xf32>
    %43 = arith.addf %40, %42 : vector<1x128x128xf32>
    %c0_15 = arith.constant 0 : index
    %c0_16 = arith.constant 0 : index
    %c0_17 = arith.constant 0 : index
    %44 = vector.load %arg12[%c0_15, %c0_16, %c0_17] : memref<1x128x128xf32, #tpu.memory_space<vmem>>, vector<1x128x128xf32>
    tpu.vector_store %arg12[%c0_15, %c0_16, %c0_17], %43 {strides = array<i32>} : memref<1x128x128xf32, #tpu.memory_space<vmem>>, vector<1x128x128xf32>,
    %cst_18 = arith.constant 0.000000e+00 : f32
    %45 = vector.broadcast %cst_18 : f32 to vector<16x128xf32>
    %46 = arith.maximumf %7, %45 : vector<16x128xf32>
    %47 = arith.truncf %46 : vector<16x128xf32> to vector<16x128xbf16>
    %c0_19 = arith.constant 0 : index
    %c0_20 = arith.constant 0 : index
    %48 = vector.load %arg5[%c0_19, %c0_20] : memref<128x128xbf16, #tpu.memory_space<vmem>>, vector<128x128xbf16>
    %cst_21 = arith.constant dense<0.000000e+00> : vector<16x128xf32>
    %49 = tpu.matmul %47, %48, %cst_21 {dimension_numbers = #tpu.dot_dimension_numbers<[1], [0], [0], [1], [0, 0, 1, 1], [], []>} : vector<16x128xbf16>, vector<128x128xbf16>, vector<16x128xf32> -> vector<16x128xf32>
    %c0_22 = arith.constant 0 : index
    %c0_23 = arith.constant 0 : index
    %50 = vector.load %arg6[%c0_22, %c0_23] : memref<1x128xf32, #tpu.memory_space<vmem>>, vector<1x128xf32>
    %51 = vector.broadcast %50 : vector<1x128xf32> to vector<16x128xf32>
    %52 = arith.addf %49, %51 : vector<16x128xf32>
    %cst_24 = arith.constant 0.000000e+00 : f32
    %53 = vector.broadcast %cst_24 : f32 to vector<16x128xf32>
    %54 = arith.maximumf %52, %53 : vector<16x128xf32>
    %55 = arith.truncf %54 : vector<16x128xf32> to vector<16x128xbf16>
    %c0_25 = arith.constant 0 : index
    %c0_26 = arith.constant 0 : index
    %56 = vector.load %arg7[%c0_25, %c0_26] : memref<128x128xbf16, #tpu.memory_space<vmem>>, vector<128x128xbf16>
    %cst_27 = arith.constant dense<0.000000e+00> : vector<16x128xf32>
    %57 = tpu.matmul %55, %56, %cst_27 {dimension_numbers = #tpu.dot_dimension_numbers<[1], [0], [0], [1], [0, 0, 1, 1], [], []>} : vector<16x128xbf16>, vector<128x128xbf16>, vector<16x128xf32> -> vector<16x128xf32>
    %c0_28 = arith.constant 0 : index
    %c0_29 = arith.constant 0 : index
    %58 = vector.load %arg8[%c0_28, %c0_29] : memref<1x128xf32, #tpu.memory_space<vmem>>, vector<1x128xf32>
    %59 = vector.broadcast %58 : vector<1x128xf32> to vector<16x128xf32>
    %60 = arith.addf %57, %59 : vector<16x128xf32>
    %cst_30 = arith.constant 0.000000e+00 : f32
    %61 = vector.broadcast %cst_30 : f32 to vector<16x128xf32>
    %62 = arith.maximumf %60, %61 : vector<16x128xf32>
    %63 = arith.truncf %62 : vector<16x128xf32> to vector<16x128xbf16>
    %c0_31 = arith.constant 0 : index
    %c0_32 = arith.constant 0 : index
    %64 = vector.load %arg9[%c0_31, %c0_32] : memref<128x128xbf16, #tpu.memory_space<vmem>>, vector<128x128xbf16>
    %cst_33 = arith.constant dense<0.000000e+00> : vector<16x128xf32>
    %65 = tpu.matmul %63, %64, %cst_33 {dimension_numbers = #tpu.dot_dimension_numbers<[1], [0], [0], [1], [0, 0, 1, 1], [], []>} : vector<16x128xbf16>, vector<128x128xbf16>, vector<16x128xf32> -> vector<16x128xf32>
    %c0_34 = arith.constant 0 : index
    %c0_35 = arith.constant 0 : index
    %66 = vector.load %arg10[%c0_34, %c0_35] : memref<1x128xf32, #tpu.memory_space<vmem>>, vector<1x128xf32>
    %67 = vector.broadcast %66 : vector<1x128xf32> to vector<16x128xf32>
    %68 = arith.addf %65, %67 : vector<16x128xf32>
    %cst_36 = arith.constant 0.000000e+00 : f32
    %69 = vector.broadcast %cst_36 : f32 to vector<16x128xf32>
    %70 = arith.subf %69, %68 : vector<16x128xf32>
    %71 = math.exp %70 : vector<16x128xf32>
    %cst_37 = arith.constant 1.000000e+00 : f32
    %72 = vector.broadcast %cst_37 : f32 to vector<16x128xf32>
    %73 = arith.addf %72, %71 : vector<16x128xf32>
    %74 = tpu.reciprocal %73 {approx = true} : vector<16x128xf32> -> vector<16x128xf32>
    %c0_38 = arith.constant 0 : index
    %c0_39 = arith.constant 0 : index
    %75 = vector.load %arg11[%c0_38, %c0_39] : memref<16x128xf32, #tpu.memory_space<vmem>>, vector<16x128xf32>
    tpu.vector_store %arg11[%c0_38, %c0_39], %74 {strides = array<i32>} : memref<16x128xf32, #tpu.memory_space<vmem>>, vector<16x128xf32>,
    return
  }
  func.func @transform_0(%arg0: i32, %arg1: i32) -> (i32, i32) {
    %c1_i32 = arith.constant 1 : i32
    %0 = arith.muli %arg0, %c1_i32 : i32
    %1 = arith.addi %0, %arg1 : i32
    %c0_i32 = arith.constant 0 : i32
    %c0_i32_0 = arith.constant 0 : i32
    return %1, %c0_i32 : i32, i32
  }
  func.func @transform_1(%arg0: i32, %arg1: i32) -> (i32, i32) {
    %c0_i32 = arith.constant 0 : i32
    %c0_i32_0 = arith.constant 0 : i32
    %c0_i32_1 = arith.constant 0 : i32
    return %c0_i32, %c0_i32_0 : i32, i32
  }
  func.func @transform_2(%arg0: i32, %arg1: i32) -> (i32, i32) {
    %c0_i32 = arith.constant 0 : i32
    %c0_i32_0 = arith.constant 0 : i32
    %c0_i32_1 = arith.constant 0 : i32
    return %c0_i32, %c0_i32_0 : i32, i32
  }
  func.func @transform_3(%arg0: i32, %arg1: i32) -> (i32, i32) {
    %c0_i32 = arith.constant 0 : i32
    %c0_i32_0 = arith.constant 0 : i32
    %c0_i32_1 = arith.constant 0 : i32
    return %c0_i32, %c0_i32_0 : i32, i32
  }
  func.func @transform_4(%arg0: i32, %arg1: i32) -> (i32, i32) {
    %c0_i32 = arith.constant 0 : i32
    %c0_i32_0 = arith.constant 0 : i32
    %c0_i32_1 = arith.constant 0 : i32
    return %c0_i32, %c0_i32_0 : i32, i32
  }
  func.func @transform_5(%arg0: i32, %arg1: i32) -> (i32, i32) {
    %c0_i32 = arith.constant 0 : i32
    %c0_i32_0 = arith.constant 0 : i32
    %c0_i32_1 = arith.constant 0 : i32
    return %c0_i32, %c0_i32_0 : i32, i32
  }
  func.func @transform_6(%arg0: i32, %arg1: i32) -> (i32, i32) {
    %c0_i32 = arith.constant 0 : i32
    %c0_i32_0 = arith.constant 0 : i32
    %c0_i32_1 = arith.constant 0 : i32
    return %c0_i32, %c0_i32_0 : i32, i32
  }
  func.func @transform_7(%arg0: i32, %arg1: i32) -> (i32, i32) {
    %c0_i32 = arith.constant 0 : i32
    %c0_i32_0 = arith.constant 0 : i32
    %c0_i32_1 = arith.constant 0 : i32
    return %c0_i32, %c0_i32_0 : i32, i32
  }
  func.func @transform_8(%arg0: i32, %arg1: i32) -> (i32, i32) {
    %c0_i32 = arith.constant 0 : i32
    %c0_i32_0 = arith.constant 0 : i32
    %c0_i32_1 = arith.constant 0 : i32
    return %c0_i32, %c0_i32_0 : i32, i32
  }
  func.func @transform_9(%arg0: i32, %arg1: i32) -> (i32, i32) {
    %c1_i32 = arith.constant 1 : i32
    %0 = arith.muli %arg0, %c1_i32 : i32
    %1 = arith.addi %0, %arg1 : i32
    %c0_i32 = arith.constant 0 : i32
    %c0_i32_0 = arith.constant 0 : i32
    return %1, %c0_i32 : i32, i32
  }
  func.func @transform_10(%arg0: i32, %arg1: i32) -> (i32, i32, i32) {
    %c0_i32 = arith.constant 0 : i32
    %c0_i32_0 = arith.constant 0 : i32
    %c0_i32_1 = arith.constant 0 : i32
    return %arg0, %c0_i32, %c0_i32_0 : i32, i32, i32
  }
}

</mosaic_0001>

<bundles_post_ra>
// kernel: tpu_custom_call.1
= control target key start
LH: loop header
LB: loop body
LE: loop exit
PB: predicated region body
PF: predicated region fallthrough
CT: control target
= control target key end

     0   :  { %16 = vsyncpa [#allocation3], 0  ;;  %s1467_s0 = inlined_call_operand.hbm [shape: bf16[16,128], index: 0, kind: input, shape index: {}]   ;;  %s1468_s1 = inlined_call_operand.hbm [shape: bf16[128,256], index: 1, kind: input, shape index: {}]   ;;  %s1469_s2 = inlined_call_operand.vmem [shape: f32[1,128], index: 2, kind: input, shape index: {}]   ;;  %s1470_s3 = inlined_call_operand.hbm [shape: bf16[128,128], index: 3, kind: input, shape index: {}]   ;;  %s1471_s4 = inlined_call_operand.vmem [shape: f32[1,128], index: 4, kind: input, shape index: {}]   ;;  %s1472_s5 = inlined_call_operand.hbm [shape: bf16[128,128], index: 5, kind: input, shape index: {}]   ;;  %s1473_s6 = inlined_call_operand.vmem [shape: f32[1,128], index: 6, kind: input, shape index: {}]   ;;  %s1474_s7 = inlined_call_operand.hbm [shape: bf16[128,128], index: 7, kind: input, shape index: {}]   ;;  %s1475_s8 = inlined_call_operand.vmem [shape: f32[1,128], index: 8, kind: input, shape index: {}]   ;;  %s1476_s9 = inlined_call_operand.hbm [shape: f32[16,128], index: 9, kind: output, shape index: {0}]   ;;  %s1477_s10 = inlined_call_operand.hbm [shape: f32[1,128,128], index: 10, kind: output, shape index: {1}]  }
   0x1   :  { %17 = vsyncpa [#allocation6], 0 }
   0x2   :  { %18 = vsyncpa [#allocation9], 0 }
   0x3   :  { %19 = vsyncpa [#allocation4], 0 }
   0x4   :  { %20 = vsyncpa [#allocation13], 0  ;;  %s1305_s13 = smov [#allocation5]  }
   0x5   :  { %s42_s14 = sshll.u32 %s1305_s13, 4  ;;  %s43_s14 = int_to_ptr.vmem [resolvable:$true] %s42_s14 }
   0x6   :  { %s1163_s15 = scalar_lea.vmem %s43_s14, 2048  ;;  %p1168_p1 = scmp.lt.s32.totalorder %s43_s14, %s43_s14 }
   0x7   :  { %p1164_p0 = scmp.ne.s32.totalorder %s43_s14, %s1163_s15  ;;  %p1169_p2 = scmp.lt.s32.totalorder %s1163_s15, %s1163_s15 }
   0x9   :  { %p1170_p3 = por %p1169_p2, %p1168_p1 }
   0xb   :  { %p1171_p4 = pnand %p1170_p3, %p1164_p0 }
   0xd   :  { %1174 = shalt.err (!%p1171_p4)
}
   0xe   :  { %s1306_s16 = smov 128   ;;  %s1307_s17 = smov 8  }
   0xf   :  { %48 = dma.hbm_to_vmem [thread:$0]  %s1468_s1, 2048, %s43_s14, [#allocation6], %s1306_s16, %s1306_s16, %s1307_s17  }
  0x10   :  { %s1308_s20 = smov [#allocation8]   ;;  %s1309_s22 = smov [#allocation2]  }
  0x11   :  { %s70_s21 = sshll.u32 %s1308_s20, 4  ;;  %s30_s23 = sshll.u32 %s1309_s22, 4  ;;  %s71_s21 = int_to_ptr.vmem [resolvable:$true] %s70_s21  ;;  %s31_s23 = int_to_ptr.vmem [resolvable:$true] %s30_s23 }
  0x12   :  { %s1183_s24 = scalar_lea.vmem %s71_s21, 1024  ;;  %p1188_p6 = scmp.lt.s32.totalorder %s71_s21, %s71_s21 }
  0x13   :  { %p1184_p5 = scmp.ne.s32.totalorder %s71_s21, %s1183_s24  ;;  %p1189_p7 = scmp.lt.s32.totalorder %s1183_s24, %s1183_s24 }
  0x15   :  { %p1190_p8 = por %p1189_p7, %p1188_p6 }
  0x17   :  { %p1191_p9 = pnand %p1190_p8, %p1184_p5 }
  0x19   :  { %1194 = shalt.err (!%p1191_p9)
}
  0x1a   :  { %s1310_s25 = smov 64   ;;  %s1311_s26 = smov 4  }
  0x1b   :  { %76 = dma.hbm_to_vmem [thread:$0]  %s1472_s5, 1024, %s71_s21, [#allocation9], %s1310_s25, %s1310_s25, %s1311_s26  }
  0x1c   :  { %s1203_s1 = scalar_lea.vmem %s31_s23, 128  ;;  %p1208_p11 = scmp.lt.s32.totalorder %s31_s23, %s31_s23 }
  0x1d   :  { %p1204_p10 = scmp.ne.s32.totalorder %s31_s23, %s1203_s1  ;;  %p1209_p12 = scmp.lt.s32.totalorder %s1203_s1, %s1203_s1 }
  0x1f   :  { %p1210_p13 = por %p1209_p12, %p1208_p11 }
  0x21   :  { %p1211_p0 = pnand %p1210_p13, %p1204_p10 }
  0x23   :  { %1214 = shalt.err (!%p1211_p0)
}
  0x24   :  { %36 = dma.hbm_to_vmem [thread:$0]  %s1467_s0, 128, %s31_s23, [#allocation3], %s1310_s25, %s1310_s25, %s1311_s26  }
  0x25   :  { %s1312_s11 = smov [#allocation7]   ;;  %s1313_s13 = smov [#allocation10]  }
  0x26   :  { %s56_s12 = sshll.u32 %s1312_s11, 4  ;;  %s84_s5 = sshll.u32 %s1313_s13, 4  ;;  %s57_s12 = int_to_ptr.vmem [resolvable:$true] %s56_s12  ;;  %s85_s5 = int_to_ptr.vmem [resolvable:$true] %s84_s5 }
  0x27   :  { %s1223_s14 = scalar_lea.vmem %s57_s12, 1024  ;;  %p1228_p2 = scmp.lt.s32.totalorder %s57_s12, %s57_s12 }
  0x28   :  { %p1224_p1 = scmp.ne.s32.totalorder %s57_s12, %s1223_s14  ;;  %p1229_p3 = scmp.lt.s32.totalorder %s1223_s14, %s1223_s14 }
  0x2a   :  { %p1230_p4 = por %p1229_p3, %p1228_p2 }
  0x2c   :  { %p1231_p5 = pnand %p1230_p4, %p1224_p1 }
  0x2e   :  { %1234 = shalt.err (!%p1231_p5)
}
  0x2f   :  { %62 = dma.hbm_to_vmem [thread:$0]  %s1470_s3, 1024, %s57_s12, [#allocation6], %s1310_s25, %s1310_s25, %s1311_s26  }
  0x30   :  { %s1243_s0 = scalar_lea.vmem %s85_s5, 1024  ;;  %p1248_p7 = scmp.lt.s32.totalorder %s85_s5, %s85_s5 }
  0x31   :  { %p1244_p6 = scmp.ne.s32.totalorder %s85_s5, %s1243_s0  ;;  %p1249_p8 = scmp.lt.s32.totalorder %s1243_s0, %s1243_s0 }
  0x33   :  { %p1250_p9 = por %p1249_p8, %p1248_p7 }
  0x35   :  { %p1251_p10 = pnand %p1250_p9, %p1244_p6 }
  0x37   :  { %1254 = shalt.err (!%p1251_p10)
}
  0x38   :  { %90 = dma.hbm_to_vmem [thread:$0]  %s1474_s7, 1024, %s85_s5, [#allocation9], %s1310_s25, %s1310_s25, %s1311_s26  }
  0x39   :  { %1295 = dma.done.wait [#allocation3], 128  }
  0x3a   :  { %1296 = vsyncadd [#allocation3], 4294967168 }
  0x3b   :  { %1297 = dma.done.wait [#allocation6], 3072  }
  0x3c   :  { %1298 = vsyncadd [#allocation6], 4294964224 }
  0x3d   :  { %1299 = dma.done.wait [#allocation9], 2048  }
  0x3e   :  { %1300 = vsyncadd [#allocation9], 4294965248  ;;  %v1314_v0 = vmov 0   ;;  %v1094_v1 = vld [vmem:[#allocation5 + $0x74] ss:$8 sps:$4 sm:$0xff]   ;;  %v269_v18 = vlaneseq  ;;  %v1315_v28 = vmov 0.0  }
  0x3f   :  { %249 = vmatprep.mubr.bf16.mxu0 %v1314_v0  ;;  %v1096_v2 = vld [vmem:[#allocation5 + $0x70] ss:$8 sps:$4 sm:$0xff]   ;;  %217 = vmatprep.subr.bf16.mxu0 %v1094_v1  ;;  %v1097_v3 = vld [vmem:[#allocation5 + $0x64] ss:$8 sps:$4 sm:$0xff]   ;;  %v1099_v4 = vld [vmem:[#allocation5 + $0x60] ss:$8 sps:$4 sm:$0xff]  }
  0x40   :  { %218 = vmatpush1.bf16.msra.mxu0 %v1096_v2  ;;  %v1100_v5 = vld [vmem:[#allocation5 + $0x54] ss:$8 sps:$4 sm:$0xff]   ;;  %v1102_v6 = vld [vmem:[#allocation5 + $0x50] ss:$8 sps:$4 sm:$0xff]   ;;  %v1103_v7 = vld [vmem:[#allocation5 + $0x44] ss:$8 sps:$4 sm:$0xff]  }
  0x41   :  { %219 = vmatprep.subr.bf16.mxu0 %v1097_v3  ;;  %v1105_v8 = vld [vmem:[#allocation5 + $0x40] ss:$8 sps:$4 sm:$0xff]   ;;  %v1106_v9 = vld [vmem:[#allocation5 + $0x34] ss:$8 sps:$4 sm:$0xff]   ;;  %v1108_v10 = vld [vmem:[#allocation5 + $0x30] ss:$8 sps:$4 sm:$0xff]  }
  0x42   :  { %v1109_v11 = vld [vmem:[#allocation5 + $0x24] ss:$8 sps:$4 sm:$0xff]   ;;  %v1111_v12 = vld [vmem:[#allocation5 + $0x20] ss:$8 sps:$4 sm:$0xff]   ;;  %v1112_v13 = vld [vmem:[#allocation5 + $0x14] ss:$8 sps:$4 sm:$0xff]  }
  0x43   :  { %v1114_v14 = vld [vmem:[#allocation5 + $0x10] ss:$8 sps:$4 sm:$0xff]   ;;  %v1115_v15 = vld [vmem:[#allocation5 + $0x4] ss:$8 sps:$4 sm:$0xff]   ;;  %v1117_v16 = vld [vmem:[#allocation5] ss:$8 sps:$4 sm:$0xff]  }
  0x44   :  { %220 = vmatpush1.bf16.msra.mxu0 %v1099_v4  ;;  %v1118_v17 = vld [vmem:[#allocation2] sm:$0xff]   ;;  %v270_v19 = vand.u32 127, %v269_v18  ;;  %vm1316_vm1 = vmmov 0   ;;  %vm363_vm2 = vcmask 130048   ;;  %v1120_v36 = vld [vmem:[#allocation7 + $0x30] sm:$0xff]   ;;  %v1121_v38 = vld [vmem:[#allocation7 + $0x28] sm:$0xff]  }
  0x45   :  { %221 = vmatprep.subr.bf16.mxu0 %v1100_v5  ;;  %v1119_v34 = vld [vmem:[#allocation7 + $0x38] sm:$0xff]   ;;  %v1122_v40 = vld [vmem:[#allocation7 + $0x20] sm:$0xff]   ;;  %v1124_v44 = vld [vmem:[#allocation7 + $0x10] sm:$0xff]   ;;  %s1317_s23 = smov [#allocation12]  }
  0x46   :  { %vm271_vm0 = vcmp.lt.s32.totalorder %v270_v19, 16  ;;  %v1123_v42 = vld [vmem:[#allocation7 + $0x18] sm:$0xff]   ;;  %v1125_v48 = vld [vmem:[#allocation7 + $0x8] sm:$0xff]   ;;  %v1126_v52 = vld [vmem:[#allocation7] sm:$0xff]   ;;  %s895_s24 = sshll.u32 %s1317_s23, 4  ;;  %s896_s24 = int_to_ptr.vmem [resolvable:$true] %s895_s24 }
  0x47   :  { %v930_v47 = vld [vmem:[%s1469_s2] ss:$0 sm:$0xff]  ;;  %v1128_v57 = vld [vmem:[#allocation8 + $0x30] sm:$0xff]   ;;  %v1129_v58 = vld [vmem:[#allocation8 + $0x28] sm:$0xff]   ;;  %s1255_s25 = scalar_lea.vmem %s896_s24, 2048  ;;  %p1260_p12 = scmp.lt.s32.totalorder %s896_s24, %s896_s24 }
  0x48   :  { %222 = vmatpush1.bf16.msra.mxu0 %v1102_v6  ;;  %v1127_v56 = vld [vmem:[#allocation8 + $0x38] sm:$0xff]   ;;  %v1130_v59 = vld [vmem:[#allocation8 + $0x20] sm:$0xff]   ;;  %v1132_v61 = vld [vmem:[#allocation8 + $0x10] sm:$0xff]   ;;  %p1256_p11 = scmp.ne.s32.totalorder %s896_s24, %s1255_s25  ;;  %p1261_p13 = scmp.lt.s32.totalorder %s1255_s25, %s1255_s25 }
  0x49   :  { %223 = vmatprep.subr.bf16.mxu0 %v1103_v7  ;;  %v1131_v60 = vld [vmem:[#allocation8 + $0x18] sm:$0xff]   ;;  %v1133_v62 = vld [vmem:[#allocation8 + $0x8] sm:$0xff]   ;;  %v1134_v63 = vld [vmem:[#allocation8] sm:$0xff]  }
  0x4a   :  { %v1135_v0 = vld [vmem:[#allocation10 + $0x38] sm:$0xff]   ;;  %v1136_v1 = vld [vmem:[#allocation10 + $0x30] sm:$0xff]   ;;  %v1137_v2 = vld [vmem:[#allocation10 + $0x28] sm:$0xff]   ;;  %p1262_p0 = por %p1261_p13, %p1260_p12 }
  0x4b   :  { %v1138_v3 = vld [vmem:[#allocation10 + $0x20] sm:$0xff]   ;;  %v1139_v4 = vld [vmem:[#allocation10 + $0x18] sm:$0xff]  }
  0x4c   :  { %224 = vmatpush1.bf16.msra.mxu0 %v1105_v8  ;;  %p1263_p1 = pnand %p1262_p0, %p1256_p11 }
  0x4d   :  { %225 = vmatprep.subr.bf16.mxu0 %v1106_v9 }
  0x50   :  { %226 = vmatpush1.bf16.msra.mxu0 %v1108_v10 }
  0x51   :  { %227 = vmatprep.subr.bf16.mxu0 %v1109_v11 }
  0x54   :  { %228 = vmatpush1.bf16.msra.mxu0 %v1111_v12 }
  0x55   :  { %229 = vmatprep.subr.bf16.mxu0 %v1112_v13 }
  0x58   :  { %230 = vmatpush1.bf16.msra.mxu0 %v1114_v14 }
  0x59   :  { %231 = vmatprep.subr.bf16.mxu0 %v1115_v15 }
  0x5c   :  { %232 = vmatpush1.bf16.msra.mxu0 %v1117_v16 }
  0x5d   :  { %1040 = vmatprep.subr.bf16.mxu0 %v1315_v28 }
  0x5f   :  { %250 = vmatmul.mubr.bf16.vlgmr.msra.gmra.mxu0 %v1118_v17 }
  0x60   :  { %1056 = vmatprep.mubr.msk.bf16.mxu0 %vm1316_vm1, %v1315_v28  ;;  %1041 = vmatpush3.bf16.msra.mxu0 %v1127_v56 }
  0x61   :  { %1042 = vmatprep.subr.bf16.mxu0 %v1315_v28 }
  0x64   :  { %1043 = vmatpush3.bf16.msra.mxu0 %v1128_v57 }
  0x65   :  { %1044 = vmatprep.subr.bf16.mxu0 %v1315_v28 }
  0x68   :  { %1045 = vmatpush3.bf16.msra.mxu0 %v1129_v58 }
  0x69   :  { %1046 = vmatprep.subr.bf16.mxu0 %v1315_v28 }
  0x6c   :  { %1047 = vmatpush3.bf16.msra.mxu0 %v1130_v59 }
  0x6d   :  { %1048 = vmatprep.subr.bf16.mxu0 %v1315_v28 }
  0x70   :  { %1049 = vmatpush3.bf16.msra.mxu0 %v1131_v60 }
  0x71   :  { %1050 = vmatprep.subr.bf16.mxu0 %v1315_v28 }
  0x74   :  { %1051 = vmatpush3.bf16.msra.mxu0 %v1132_v61 }
  0x75   :  { %1052 = vmatprep.subr.bf16.mxu0 %v1315_v28 }
  0x78   :  { %1053 = vmatpush3.bf16.msra.mxu0 %v1133_v62 }
  0x79   :  { %1054 = vmatprep.subr.bf16.mxu0 %v1315_v28 }
  0x7c   :  { %1055 = vmatpush3.bf16.msra.mxu0 %v1134_v63 }
 0x11f   :  { %v251_v20 = vpop.f32.mrf.mxu0 }
 0x120   :  { %v274_v21 = vsel %vm271_vm0, %v251_v20, -1e+30 }
 0x121   :  { %276 = vmax.xlane.f32.xlu0 %v274_v21  ;;  %v253_v22 = vpop.f32.mrf.mxu0 }
 0x122   :  { %v267_v51 = vadd.f32 %v930_v47, %v253_v22 }
 0x123   :  { %v255_v23 = vpop.f32.mrf.mxu0 }
 0x124   :  { %v517_v54 = vmax.f32 %v267_v51, 0.0 }
 0x125   :  { %v257_v45 = vpop.f32.mrf.mxu0 }
 0x126   :  { %v268_v49 = vadd.f32 %v930_v47, %v257_v45 }
 0x128   :  { %v518_v53 = vmax.f32 %v268_v49, 0.0 }
 0x12a   :  { %v519_v55 = vpack.c.bf16 %v518_v53, %v517_v54 }
 0x1aa   :  { %v277_v24 = vpop.xlane.xlu0 %276 }
 0x1ab   :  { %v280_v25 = vsub.f32 %v274_v21, %v277_v24  ;;  %v939_v21 = vld [vmem:[%s1471_s4] ss:$0 sm:$0xff] }
 0x1ad   :  { %v282_v26 = vmul.f32 1.442695, %v280_v25 }
 0x1af   :  { %1143 = vpow2.f32 %v282_v26 }
 0x1bc   :  { %v1144_v27 = vpop.eup %1143 }
 0x1bd   :  { %286 = vadd.xlane.f32.xlu0 %v1144_v27 }
 0x246   :  { %v287_v29 = vpop.xlane.xlu0 %286 }
 0x247   :  { %1145 = vrcp.f32 %v287_v29 }
 0x254   :  { %v1146_v30 = vpop.eup %1145 }
 0x255   :  { %v291_v31 = vmul.f32 %v1146_v30, %v1144_v27 }
 0x257   :  { %v310_v32 = vpack.c.bf16 %v1315_v28, %v291_v31 }
 0x259   :  { %347 = vxpose.xlu1.c.b16.start.end [1/1] (short) %v310_v32, 128  ;;  %1002 = vmatprep.subr.bf16.mxu1 %v310_v32 }
 0x25a   :  { %1003 = vmatpush3.bf16.msra.mxu1 %v310_v32  ;;  %v1140_v32 = vld [vmem:[#allocation10 + $0x10] sm:$0xff]  }
 0x25b   :  { %1020 = vmatprep.subr.bf16.mxu1 %v1315_v28 }
 0x2bb   :  { %v355_v33 = vpop.trf.xlu1 }
 0x2bc   :  { %1004 = vmatprep.mubr.msk.bf16.mxu1 %vm363_vm2, %v355_v33  ;;  %v1141_v33 = vld [vmem:[#allocation10 + $0x8] sm:$0xff]  }
 0x2bf   :  { %v356_v35 = vpop.trf.xlu1 }
 0x2c0   :  { %1005 = vmatmul.mubr.msk.bf16.vlgmr.msra.gmra.mxu1 %vm363_vm2, %v356_v35  ;;  %v948_v35 = vld [vmem:[%s1473_s6] ss:$0 sm:$0xff] }
 0x2c1   :  { %1021 = vmatpush3.bf16.msra.mxu1 %v1119_v34  ;;  %v1142_v34 = vld [vmem:[#allocation10] sm:$0xff]  }
 0x2c2   :  { %1022 = vmatprep.subr.bf16.mxu1 %v1315_v28 }
 0x2c3   :  { %v357_v37 = vpop.trf.xlu1 }
 0x2c4   :  { %1008 = vmatprep.mubr.msk.bf16.mxu1 %vm363_vm2, %v357_v37 }
 0x2c5   :  { %1023 = vmatpush3.bf16.msra.mxu1 %v1120_v36 }
 0x2c6   :  { %1024 = vmatprep.subr.bf16.mxu1 %v1315_v28 }
 0x2c7   :  { %v358_v39 = vpop.trf.xlu1 }
 0x2c8   :  { %1009 = vmatmul.mubr.msk.bf16.gmra.mxu1 %vm363_vm2, %v358_v39 }
 0x2c9   :  { %1025 = vmatpush3.bf16.msra.mxu1 %v1121_v38 }
 0x2ca   :  { %1026 = vmatprep.subr.bf16.mxu1 %v1315_v28 }
 0x2cb   :  { %v359_v41 = vpop.trf.xlu1 }
 0x2cc   :  { %1012 = vmatprep.mubr.msk.bf16.mxu1 %vm363_vm2, %v359_v41 }
 0x2cd   :  { %1027 = vmatpush3.bf16.msra.mxu1 %v1122_v40 }
 0x2ce   :  { %1028 = vmatprep.subr.bf16.mxu1 %v1315_v28 }
 0x2cf   :  { %v360_v43 = vpop.trf.xlu1 }
 0x2d0   :  { %1013 = vmatmul.mubr.msk.bf16.gmra.mxu1 %vm363_vm2, %v360_v43 }
 0x2d1   :  { %1029 = vmatpush3.bf16.msra.mxu1 %v1123_v42 }
 0x2d2   :  { %1030 = vmatprep.subr.bf16.mxu1 %v1315_v28 }
 0x2d3   :  { %v361_v46 = vpop.trf.xlu1 }
 0x2d4   :  { %1016 = vmatprep.mubr.msk.bf16.mxu1 %vm363_vm2, %v361_v46 }
 0x2d5   :  { %1031 = vmatpush3.bf16.msra.mxu1 %v1124_v44 }
 0x2d6   :  { %1032 = vmatprep.subr.bf16.mxu1 %v1315_v28 }
 0x2d7   :  { %v362_v50 = vpop.trf.xlu1 }
 0x2d8   :  { %1017 = vmatmul.mubr.msk.bf16.gmra.mxu1 %vm363_vm2, %v362_v50 }
 0x2d9   :  { %1033 = vmatpush3.bf16.msra.mxu1 %v1125_v48  ;;  %1036 = vmatprep.mubr.msk.bf16.mxu1 %vm1316_vm1, %v1315_v28 }
 0x2da   :  { %1034 = vmatprep.subr.bf16.mxu1 %v1315_v28 }
 0x2dd   :  { %1035 = vmatpush3.bf16.msra.mxu1 %v1126_v52 }
 0x2de   :  { %1060 = vmatprep.subr.bf16.mxu1 %v1315_v28 }
 0x2e0   :  { %1037 = vmatmul.mubr.bf16.vlgmr.msra.gmra.mxu1 %v519_v55 }
 0x2e1   :  { %1076 = vmatprep.mubr.msk.bf16.mxu1 %vm1316_vm1, %v1315_v28  ;;  %1061 = vmatpush3.bf16.msra.mxu1 %v1135_v0 }
 0x2e2   :  { %1062 = vmatprep.subr.bf16.mxu1 %v1315_v28 }
 0x2e5   :  { %1063 = vmatpush3.bf16.msra.mxu1 %v1136_v1 }
 0x2e6   :  { %1064 = vmatprep.subr.bf16.mxu1 %v1315_v28 }
 0x2e9   :  { %1065 = vmatpush3.bf16.msra.mxu1 %v1137_v2 }
 0x2ea   :  { %1066 = vmatprep.subr.bf16.mxu1 %v1315_v28 }
 0x2ed   :  { %1067 = vmatpush3.bf16.msra.mxu1 %v1138_v3 }
 0x2ee   :  { %1068 = vmatprep.subr.bf16.mxu1 %v1315_v28 }
 0x2f1   :  { %1069 = vmatpush3.bf16.msra.mxu1 %v1139_v4 }
 0x2f2   :  { %1070 = vmatprep.subr.bf16.mxu1 %v1315_v28 }
 0x2f5   :  { %1071 = vmatpush3.bf16.msra.mxu1 %v1140_v32 }
 0x2f6   :  { %1072 = vmatprep.subr.bf16.mxu1 %v1315_v28 }
 0x2f9   :  { %1073 = vmatpush3.bf16.msra.mxu1 %v1141_v33 }
 0x2fa   :  { %1074 = vmatprep.subr.bf16.mxu1 %v1315_v28 }
 0x2fd   :  { %1075 = vmatpush3.bf16.msra.mxu1 %v1142_v34 }
 0x380   :  { %v1006_v5 = vpop.f32.mrf.mxu1 }
 0x381   :  { %503 = vst [vmem:[#allocation12 + $0x10] sm:$0xff] %v1006_v5 }
 0x382   :  { %v422_v6 = vpop.f32.mrf.mxu1 }
 0x383   :  { %501 = vst [vmem:[#allocation12] sm:$0xff] %v422_v6 }
 0x384   :  { %v1007_v7 = vpop.f32.mrf.mxu1 }
 0x385   :  { %504 = vst [vmem:[#allocation12 + $0x18] sm:$0xff] %v1007_v7 }
 0x386   :  { %v425_v8 = vpop.f32.mrf.mxu1 }
 0x387   :  { %502 = vst [vmem:[#allocation12 + $0x8] sm:$0xff] %v425_v8 }
 0x388   :  { %v1010_v9 = vpop.f32.mrf.mxu1 }
 0x389   :  { %507 = vst [vmem:[#allocation12 + $0x30] sm:$0xff] %v1010_v9 }
 0x38a   :  { %v438_v10 = vpop.f32.mrf.mxu1 }
 0x38b   :  { %505 = vst [vmem:[#allocation12 + $0x20] sm:$0xff] %v438_v10 }
 0x38c   :  { %v1011_v11 = vpop.f32.mrf.mxu1 }
 0x38d   :  { %508 = vst [vmem:[#allocation12 + $0x38] sm:$0xff] %v1011_v11 }
 0x38e   :  { %v441_v12 = vpop.f32.mrf.mxu1 }
 0x38f   :  { %506 = vst [vmem:[#allocation12 + $0x28] sm:$0xff] %v441_v12 }
 0x390   :  { %v1014_v13 = vpop.f32.mrf.mxu1 }
 0x391   :  { %511 = vst [vmem:[#allocation12 + $0x50] sm:$0xff] %v1014_v13 }
 0x392   :  { %v454_v14 = vpop.f32.mrf.mxu1 }
 0x393   :  { %509 = vst [vmem:[#allocation12 + $0x40] sm:$0xff] %v454_v14 }
 0x394   :  { %v1015_v15 = vpop.f32.mrf.mxu1 }
 0x395   :  { %512 = vst [vmem:[#allocation12 + $0x58] sm:$0xff] %v1015_v15 }
 0x396   :  { %v457_v16 = vpop.f32.mrf.mxu1 }
 0x397   :  { %510 = vst [vmem:[#allocation12 + $0x48] sm:$0xff] %v457_v16 }
 0x398   :  { %v1018_v17 = vpop.f32.mrf.mxu1 }
 0x399   :  { %515 = vst [vmem:[#allocation12 + $0x70] sm:$0xff] %v1018_v17 }
 0x39a   :  { %v470_v18 = vpop.f32.mrf.mxu1 }
 0x39b   :  { %513 = vst [vmem:[#allocation12 + $0x60] sm:$0xff] %v470_v18 }
 0x39c   :  { %v1019_v19 = vpop.f32.mrf.mxu1 }
 0x39d   :  { %516 = vst [vmem:[#allocation12 + $0x78] sm:$0xff] %v1019_v19 }
 0x39e   :  { %v473_v20 = vpop.f32.mrf.mxu1 }
 0x39f   :  { %514 = vst [vmem:[#allocation12 + $0x68] sm:$0xff] %v473_v20 }
 0x3a0   :  { %v625_v22 = vpop.f32.mrf.mxu1 }
 0x3a1   :  { %v626_v24 = vadd.f32 %v939_v21, %v625_v22 }
 0x3a2   :  { %v1038_v23 = vpop.f32.mrf.mxu1 }
 0x3a3   :  { %v632_v29 = vmax.f32 %v626_v24, 0.0 }
 0x3a4   :  { %v628_v25 = vpop.f32.mrf.mxu1 }
 0x3a5   :  { %v629_v26 = vadd.f32 %v939_v21, %v628_v25 }
 0x3a6   :  { %v1039_v27 = vpop.f32.mrf.mxu1 }
 0x3a7   :  { %v633_v30 = vmax.f32 %v629_v26, 0.0 }
 0x3a9   :  { %v634_v31 = vpack.c.bf16 %v633_v30, %v632_v29 }
 0x3ab   :  { %1057 = vmatmul.mubr.bf16.vlgmr.msra.gmra.mxu0 %v634_v31 }
 0x46b   :  { %v740_v36 = vpop.f32.mrf.mxu0 }
 0x46c   :  { %v741_v38 = vadd.f32 %v948_v35, %v740_v36 }
 0x46d   :  { %v1058_v37 = vpop.f32.mrf.mxu0 }
 0x46e   :  { %v747_v42 = vmax.f32 %v741_v38, 0.0 }
 0x46f   :  { %v743_v39 = vpop.f32.mrf.mxu0 }
 0x470   :  { %v744_v40 = vadd.f32 %v948_v35, %v743_v39 }
 0x471   :  { %v1059_v41 = vpop.f32.mrf.mxu0 }
 0x472   :  { %v748_v43 = vmax.f32 %v744_v40, 0.0 }
 0x474   :  { %v749_v44 = vpack.c.bf16 %v748_v43, %v747_v42 }
 0x476   :  { %1077 = vmatmul.mubr.bf16.vlgmr.msra.gmra.mxu1 %v749_v44 }
 0x477   :  { %1266 = shalt.err (!%p1263_p1)
}
 0x478   :  { %901 = dma.vmem_to_hbm [thread:$0]  %s896_s24, 2048, %s1477_s10, [#allocation13], %s1306_s16, %s1306_s16, %s1307_s17  }
 0x479   :  { %v957_v28 = vld [vmem:[%s1475_s8] ss:$0 sm:$0xff]  ;;  %s1318_s8 = smov [#allocation11]  }
 0x47a   :  { %s883_s10 = sshll.u32 %s1318_s8, 4  ;;  %s884_s10 = int_to_ptr.vmem [resolvable:$true] %s883_s10 }
 0x47b   :  { %s1275_s1 = scalar_lea.vmem %s884_s10, 256  ;;  %p1280_p3 = scmp.lt.s32.totalorder %s884_s10, %s884_s10 }
 0x47c   :  { %p1276_p2 = scmp.ne.s32.totalorder %s884_s10, %s1275_s1  ;;  %p1281_p4 = scmp.lt.s32.totalorder %s1275_s1, %s1275_s1 }
 0x47e   :  { %p1282_p5 = por %p1281_p4, %p1280_p3 }
 0x480   :  { %p1283_p6 = pnand %p1282_p5, %p1276_p2 }
 0x536   :  { %v855_v45 = vpop.f32.mrf.mxu1 }
 0x537   :  { %v856_v46 = vadd.f32 %v957_v28, %v855_v45 }
 0x538   :  { %v1078_v47 = vpop.f32.mrf.mxu1 }
 0x539   :  { %v862_v48 = vsub.f32 0.0, %v856_v46 }
 0x53a   :  { %v858_v49 = vpop.f32.mrf.mxu1 }
 0x53b   :  { %v864_v50 = vmul.f32 1.442695, %v862_v48  ;;  %v859_v51 = vadd.f32 %v957_v28, %v858_v49 }
 0x53c   :  { %v1079_v52 = vpop.f32.mrf.mxu1 }
 0x53d   :  { %1147 = vpow2.f32 %v864_v50  ;;  %v863_v53 = vsub.f32 0.0, %v859_v51 }
 0x53f   :  { %v866_v54 = vmul.f32 1.442695, %v863_v53 }
 0x541   :  { %1149 = vpow2.f32 %v866_v54 }
 0x54a   :  { %v1148_v55 = vpop.eup %1147 }
 0x54b   :  { %v868_v56 = vadd.f32 1.0, %v1148_v55 }
 0x54d   :  { %1151 = vrcp.f32 %v868_v56 }
 0x54e   :  { %v1150_v57 = vpop.eup %1149 }
 0x54f   :  { %v869_v58 = vadd.f32 1.0, %v1150_v57 }
 0x551   :  { %1153 = vrcp.f32 %v869_v58 }
 0x55a   :  { %v1152_v59 = vpop.eup %1151 }
 0x55b   :  { %872 = vst [vmem:[#allocation11] sm:$0xff] %v1152_v59 }
 0x55e   :  { %v1154_v60 = vpop.eup %1153 }
 0x55f   :  { %873 = vst [vmem:[#allocation11 + $0x8] sm:$0xff] %v1154_v60 }
 0x560   :  { %1286 = shalt.err (!%p1283_p6)
}
 0x561   :  { %889 = dma.vmem_to_hbm [thread:$0]  %s884_s10, 256, %s1476_s9, [#allocation4], %s1306_s16, %s1306_s16, %s1307_s17  }
 0x562   :  { %1301 = dma.done.wait [#allocation4], 256  }
 0x563   :  { %1302 = vsyncadd [#allocation4], 4294967040 }
 0x564   :  { %1303 = dma.done.wait [#allocation13], 2048  }
 0x565   :  { %1304 = vsyncadd [#allocation13], 4294965248 }
 0x566   :  { %908 = vsyncpa [#allocation3], 1 }
 0x567   :  { %909 = vsyncpa [#allocation6], 1 }
 0x568   :  { %910 = vsyncpa [#allocation9], 1 }
 0x569   :  { %911 = vsyncpa [#allocation4], 1 }
 0x56a   :  { %912 = vsyncpa [#allocation13], 1 }

// kernel: tpu_custom_call.1
= control target key start
LH: loop header
LB: loop body
LE: loop exit
PB: predicated region body
PF: predicated region fallthrough
CT: control target
= control target key end

     0   :  { %16 = vsyncpa [#allocation3], 0  ;;  %s1467_s0 = inlined_call_operand.hbm [shape: bf16[16,128], index: 0, kind: input, shape index: {}]   ;;  %s1468_s1 = inlined_call_operand.hbm [shape: bf16[128,256], index: 1, kind: input, shape index: {}]   ;;  %s1469_s2 = inlined_call_operand.vmem [shape: f32[1,128], index: 2, kind: input, shape index: {}]   ;;  %s1470_s3 = inlined_call_operand.hbm [shape: bf16[128,128], index: 3, kind: input, shape index: {}]   ;;  %s1471_s4 = inlined_call_operand.vmem [shape: f32[1,128], index: 4, kind: input, shape index: {}]   ;;  %s1472_s5 = inlined_call_operand.hbm [shape: bf16[128,128], index: 5, kind: input, shape index: {}]   ;;  %s1473_s6 = inlined_call_operand.vmem [shape: f32[1,128], index: 6, kind: input, shape index: {}]   ;;  %s1474_s7 = inlined_call_operand.hbm [shape: bf16[128,128], index: 7, kind: input, shape index: {}]   ;;  %s1475_s8 = inlined_call_operand.vmem [shape: f32[1,128], index: 8, kind: input, shape index: {}]   ;;  %s1476_s9 = inlined_call_operand.hbm [shape: f32[16,128], index: 9, kind: output, shape index: {0}]   ;;  %s1477_s10 = inlined_call_operand.hbm [shape: f32[1,128,128], index: 10, kind: output, shape index: {1}]  }
   0x1   :  { %17 = vsyncpa [#allocation6], 0 }
   0x2   :  { %18 = vsyncpa [#allocation9], 0 }
   0x3   :  { %19 = vsyncpa [#allocation4], 0 }
   0x4   :  { %20 = vsyncpa [#allocation13], 0  ;;  %s1305_s13 = smov [#allocation5]  }
   0x5   :  { %s42_s14 = sshll.u32 %s1305_s13, 4  ;;  %s43_s14 = int_to_ptr.vmem [resolvable:$true] %s42_s14 }
   0x6   :  { %s1163_s15 = scalar_lea.vmem %s43_s14, 2048  ;;  %p1168_p1 = scmp.lt.s32.totalorder %s43_s14, %s43_s14 }
   0x7   :  { %p1164_p0 = scmp.ne.s32.totalorder %s43_s14, %s1163_s15  ;;  %p1169_p2 = scmp.lt.s32.totalorder %s1163_s15, %s1163_s15 }
   0x9   :  { %p1170_p3 = por %p1169_p2, %p1168_p1 }
   0xb   :  { %p1171_p4 = pnand %p1170_p3, %p1164_p0 }
   0xd   :  { %1174 = shalt.err (!%p1171_p4)
}
   0xe   :  { %s1306_s16 = smov 128   ;;  %s1307_s17 = smov 8  }
   0xf   :  { %48 = dma.hbm_to_vmem [thread:$0]  %s1468_s1, 2048, %s43_s14, [#allocation6], %s1306_s16, %s1306_s16, %s1307_s17  }
  0x10   :  { %s1308_s20 = smov [#allocation8]   ;;  %s1309_s22 = smov [#allocation2]  }
  0x11   :  { %s70_s21 = sshll.u32 %s1308_s20, 4  ;;  %s30_s23 = sshll.u32 %s1309_s22, 4  ;;  %s71_s21 = int_to_ptr.vmem [resolvable:$true] %s70_s21  ;;  %s31_s23 = int_to_ptr.vmem [resolvable:$true] %s30_s23 }
  0x12   :  { %s1183_s24 = scalar_lea.vmem %s71_s21, 1024  ;;  %p1188_p6 = scmp.lt.s32.totalorder %s71_s21, %s71_s21 }
  0x13   :  { %p1184_p5 = scmp.ne.s32.totalorder %s71_s21, %s1183_s24  ;;  %p1189_p7 = scmp.lt.s32.totalorder %s1183_s24, %s1183_s24 }
  0x15   :  { %p1190_p8 = por %p1189_p7, %p1188_p6 }
  0x17   :  { %p1191_p9 = pnand %p1190_p8, %p1184_p5 }
  0x19   :  { %1194 = shalt.err (!%p1191_p9)
}
  0x1a   :  { %s1310_s25 = smov 64   ;;  %s1311_s26 = smov 4  }
  0x1b   :  { %76 = dma.hbm_to_vmem [thread:$0]  %s1472_s5, 1024, %s71_s21, [#allocation9], %s1310_s25, %s1310_s25, %s1311_s26  }
  0x1c   :  { %s1203_s1 = scalar_lea.vmem %s31_s23, 128  ;;  %p1208_p11 = scmp.lt.s32.totalorder %s31_s23, %s31_s23 }
  0x1d   :  { %p1204_p10 = scmp.ne.s32.totalorder %s31_s23, %s1203_s1  ;;  %p1209_p12 = scmp.lt.s32.totalorder %s1203_s1, %s1203_s1 }
  0x1f   :  { %p1210_p13 = por %p1209_p12, %p1208_p11 }
  0x21   :  { %p1211_p0 = pnand %p1210_p13, %p1204_p10 }
  0x23   :  { %1214 = shalt.err (!%p1211_p0)
}
  0x24   :  { %36 = dma.hbm_to_vmem [thread:$0]  %s1467_s0, 128, %s31_s23, [#allocation3], %s1310_s25, %s1310_s25, %s1311_s26  }
  0x25   :  { %s1312_s11 = smov [#allocation7]   ;;  %s1313_s13 = smov [#allocation10]  }
  0x26   :  { %s56_s12 = sshll.u32 %s1312_s11, 4  ;;  %s84_s5 = sshll.u32 %s1313_s13, 4  ;;  %s57_s12 = int_to_ptr.vmem [resolvable:$true] %s56_s12  ;;  %s85_s5 = int_to_ptr.vmem [resolvable:$true] %s84_s5 }
  0x27   :  { %s1223_s14 = scalar_lea.vmem %s57_s12, 1024  ;;  %p1228_p2 = scmp.lt.s32.totalorder %s57_s12, %s57_s12 }
  0x28   :  { %p1224_p1 = scmp.ne.s32.totalorder %s57_s12, %s1223_s14  ;;  %p1229_p3 = scmp.lt.s32.totalorder %s1223_s14, %s1223_s14 }
  0x2a   :  { %p1230_p4 = por %p1229_p3, %p1228_p2 }
  0x2c   :  { %p1231_p5 = pnand %p1230_p4, %p1224_p1 }
  0x2e   :  { %1234 = shalt.err (!%p1231_p5)
}
  0x2f   :  { %62 = dma.hbm_to_vmem [thread:$0]  %s1470_s3, 1024, %s57_s12, [#allocation6], %s1310_s25, %s1310_s25, %s1311_s26  }
  0x30   :  { %s1243_s0 = scalar_lea.vmem %s85_s5, 1024  ;;  %p1248_p7 = scmp.lt.s32.totalorder %s85_s5, %s85_s5 }
  0x31   :  { %p1244_p6 = scmp.ne.s32.totalorder %s85_s5, %s1243_s0  ;;  %p1249_p8 = scmp.lt.s32.totalorder %s1243_s0, %s1243_s0 }
  0x33   :  { %p1250_p9 = por %p1249_p8, %p1248_p7 }
  0x35   :  { %p1251_p10 = pnand %p1250_p9, %p1244_p6 }
  0x37   :  { %1254 = shalt.err (!%p1251_p10)
}
  0x38   :  { %90 = dma.hbm_to_vmem [thread:$0]  %s1474_s7, 1024, %s85_s5, [#allocation9], %s1310_s25, %s1310_s25, %s1311_s26  }
  0x39   :  { %1295 = dma.done.wait [#allocation3], 128  }
  0x3a   :  { %1296 = vsyncadd [#allocation3], 4294967168 }
  0x3b   :  { %1297 = dma.done.wait [#allocation6], 3072  }
  0x3c   :  { %1298 = vsyncadd [#allocation6], 4294964224 }
  0x3d   :  { %1299 = dma.done.wait [#allocation9], 2048  }
  0x3e   :  { %1300 = vsyncadd [#allocation9], 4294965248  ;;  %v1314_v0 = vmov 0   ;;  %v1094_v1 = vld [vmem:[#allocation5 + $0x74] ss:$8 sps:$4 sm:$0xff]   ;;  %v269_v18 = vlaneseq  ;;  %v1315_v28 = vmov 0.0  }
  0x3f   :  { %249 = vmatprep.mubr.bf16.mxu0 %v1314_v0  ;;  %v1096_v2 = vld [vmem:[#allocation5 + $0x70] ss:$8 sps:$4 sm:$0xff]   ;;  %217 = vmatprep.subr.bf16.mxu0 %v1094_v1  ;;  %v1097_v3 = vld [vmem:[#allocation5 + $0x64] ss:$8 sps:$4 sm:$0xff]   ;;  %v1099_v4 = vld [vmem:[#allocation5 + $0x60] ss:$8 sps:$4 sm:$0xff]  }
  0x40   :  { %218 = vmatpush1.bf16.msra.mxu0 %v1096_v2  ;;  %v1100_v5 = vld [vmem:[#allocation5 + $0x54] ss:$8 sps:$4 sm:$0xff]   ;;  %v1102_v6 = vld [vmem:[#allocation5 + $0x50] ss:$8 sps:$4 sm:$0xff]   ;;  %v1103_v7 = vld [vmem:[#allocation5 + $0x44] ss:$8 sps:$4 sm:$0xff]  }
  0x41   :  { %219 = vmatprep.subr.bf16.mxu0 %v1097_v3  ;;  %v1105_v8 = vld [vmem:[#allocation5 + $0x40] ss:$8 sps:$4 sm:$0xff]   ;;  %v1106_v9 = vld [vmem:[#allocation5 + $0x34] ss:$8 sps:$4 sm:$0xff]   ;;  %v1108_v10 = vld [vmem:[#allocation5 + $0x30] ss:$8 sps:$4 sm:$0xff]  }
  0x42   :  { %v1109_v11 = vld [vmem:[#allocation5 + $0x24] ss:$8 sps:$4 sm:$0xff]   ;;  %v1111_v12 = vld [vmem:[#allocation5 + $0x20] ss:$8 sps:$4 sm:$0xff]   ;;  %v1112_v13 = vld [vmem:[#allocation5 + $0x14] ss:$8 sps:$4 sm:$0xff]  }
  0x43   :  { %v1114_v14 = vld [vmem:[#allocation5 + $0x10] ss:$8 sps:$4 sm:$0xff]   ;;  %v1115_v15 = vld [vmem:[#allocation5 + $0x4] ss:$8 sps:$4 sm:$0xff]   ;;  %v1117_v16 = vld [vmem:[#allocation5] ss:$8 sps:$4 sm:$0xff]  }
  0x44   :  { %220 = vmatpush1.bf16.msra.mxu0 %v1099_v4  ;;  %v1118_v17 = vld [vmem:[#allocation2] sm:$0xff]   ;;  %v270_v19 = vand.u32 127, %v269_v18  ;;  %vm1316_vm1 = vmmov 0   ;;  %vm363_vm2 = vcmask 130048   ;;  %v1120_v36 = vld [vmem:[#allocation7 + $0x30] sm:$0xff]   ;;  %v1121_v38 = vld [vmem:[#allocation7 + $0x28] sm:$0xff]  }
  0x45   :  { %221 = vmatprep.subr.bf16.mxu0 %v1100_v5  ;;  %v1119_v34 = vld [vmem:[#allocation7 + $0x38] sm:$0xff]   ;;  %v1122_v40 = vld [vmem:[#allocation7 + $0x20] sm:$0xff]   ;;  %v1124_v44 = vld [vmem:[#allocation7 + $0x10] sm:$0xff]   ;;  %s1317_s23 = smov [#allocation12]  }
  0x46   :  { %vm271_vm0 = vcmp.lt.s32.totalorder %v270_v19, 16  ;;  %v1123_v42 = vld [vmem:[#allocation7 + $0x18] sm:$0xff]   ;;  %v1125_v48 = vld [vmem:[#allocation7 + $0x8] sm:$0xff]   ;;  %v1126_v52 = vld [vmem:[#allocation7] sm:$0xff]   ;;  %s895_s24 = sshll.u32 %s1317_s23, 4  ;;  %s896_s24 = int_to_ptr.vmem [resolvable:$true] %s895_s24 }
  0x47   :  { %v930_v47 = vld [vmem:[%s1469_s2] ss:$0 sm:$0xff]  ;;  %v1128_v57 = vld [vmem:[#allocation8 + $0x30] sm:$0xff]   ;;  %v1129_v58 = vld [vmem:[#allocation8 + $0x28] sm:$0xff]   ;;  %s1255_s25 = scalar_lea.vmem %s896_s24, 2048  ;;  %p1260_p12 = scmp.lt.s32.totalorder %s896_s24, %s896_s24 }
  0x48   :  { %222 = vmatpush1.bf16.msra.mxu0 %v1102_v6  ;;  %v1127_v56 = vld [vmem:[#allocation8 + $0x38] sm:$0xff]   ;;  %v1130_v59 = vld [vmem:[#allocation8 + $0x20] sm:$0xff]   ;;  %v1132_v61 = vld [vmem:[#allocation8 + $0x10] sm:$0xff]   ;;  %p1256_p11 = scmp.ne.s32.totalorder %s896_s24, %s1255_s25  ;;  %p1261_p13 = scmp.lt.s32.totalorder %s1255_s25, %s1255_s25 }
  0x49   :  { %223 = vmatprep.subr.bf16.mxu0 %v1103_v7  ;;  %v1131_v60 = vld [vmem:[#allocation8 + $0x18] sm:$0xff]   ;;  %v1133_v62 = vld [vmem:[#allocation8 + $0x8] sm:$0xff]   ;;  %v1134_v63 = vld [vmem:[#allocation8] sm:$0xff]  }
  0x4a   :  { %v1135_v0 = vld [vmem:[#allocation10 + $0x38] sm:$0xff]   ;;  %v1136_v1 = vld [vmem:[#allocation10 + $0x30] sm:$0xff]   ;;  %v1137_v2 = vld [vmem:[#allocation10 + $0x28] sm:$0xff]   ;;  %p1262_p0 = por %p1261_p13, %p1260_p12 }
  0x4b   :  { %v1138_v3 = vld [vmem:[#allocation10 + $0x20] sm:$0xff]   ;;  %v1139_v4 = vld [vmem:[#allocation10 + $0x18] sm:$0xff]  }
  0x4c   :  { %224 = vmatpush1.bf16.msra.mxu0 %v1105_v8  ;;  %p1263_p1 = pnand %p1262_p0, %p1256_p11 }
  0x4d   :  { %225 = vmatprep.subr.bf16.mxu0 %v1106_v9 }
  0x50   :  { %226 = vmatpush1.bf16.msra.mxu0 %v1108_v10 }
  0x51   :  { %227 = vmatprep.subr.bf16.mxu0 %v1109_v11 }
  0x54   :  { %228 = vmatpush1.bf16.msra.mxu0 %v1111_v12 }
  0x55   :  { %229 = vmatprep.subr.bf16.mxu0 %v1112_v13 }
  0x58   :  { %230 = vmatpush1.bf16.msra.mxu0 %v1114_v14 }
  0x59   :  { %231 = vmatprep.subr.bf16.mxu0 %v1115_v15 }
  0x5c   :  { %232 = vmatpush1.bf16.msra.mxu0 %v1117_v16 }
  0x5d   :  { %1040 = vmatprep.subr.bf16.mxu0 %v1315_v28 }
  0x5f   :  { %250 = vmatmul.mubr.bf16.vlgmr.msra.gmra.mxu0 %v1118_v17 }
  0x60   :  { %1056 = vmatprep.mubr.msk.bf16.mxu0 %vm1316_vm1, %v1315_v28  ;;  %1041 = vmatpush3.bf16.msra.mxu0 %v1127_v56 }
  0x61   :  { %1042 = vmatprep.subr.bf16.mxu0 %v1315_v28 }
  0x64   :  { %1043 = vmatpush3.bf16.msra.mxu0 %v1128_v57 }
  0x65   :  { %1044 = vmatprep.subr.bf16.mxu0 %v1315_v28 }
  0x68   :  { %1045 = vmatpush3.bf16.msra.mxu0 %v1129_v58 }
  0x69   :  { %1046 = vmatprep.subr.bf16.mxu0 %v1315_v28 }
  0x6c   :  { %1047 = vmatpush3.bf16.msra.mxu0 %v1130_v59 }
  0x6d   :  { %1048 = vmatprep.subr.bf16.mxu0 %v1315_v28 }
  0x70   :  { %1049 = vmatpush3.bf16.msra.mxu0 %v1131_v60 }
  0x71   :  { %1050 = vmatprep.subr.bf16.mxu0 %v1315_v28 }
  0x74   :  { %1051 = vmatpush3.bf16.msra.mxu0 %v1132_v61 }
  0x75   :  { %1052 = vmatprep.subr.bf16.mxu0 %v1315_v28 }
  0x78   :  { %1053 = vmatpush3.bf16.msra.mxu0 %v1133_v62 }
  0x79   :  { %1054 = vmatprep.subr.bf16.mxu0 %v1315_v28 }
  0x7c   :  { %1055 = vmatpush3.bf16.msra.mxu0 %v1134_v63 }
 0x11f   :  { %v251_v20 = vpop.f32.mrf.mxu0 }
 0x120   :  { %v274_v21 = vsel %vm271_vm0, %v251_v20, -1e+30 }
 0x121   :  { %276 = vmax.xlane.f32.xlu0 %v274_v21  ;;  %v253_v22 = vpop.f32.mrf.mxu0 }
 0x122   :  { %v267_v51 = vadd.f32 %v930_v47, %v253_v22 }
 0x123   :  { %v255_v23 = vpop.f32.mrf.mxu0 }
 0x124   :  { %v517_v54 = vmax.f32 %v267_v51, 0.0 }
 0x125   :  { %v257_v45 = vpop.f32.mrf.mxu0 }
 0x126   :  { %v268_v49 = vadd.f32 %v930_v47, %v257_v45 }
 0x128   :  { %v518_v53 = vmax.f32 %v268_v49, 0.0 }
 0x12a   :  { %v519_v55 = vpack.c.bf16 %v518_v53, %v517_v54 }
 0x1aa   :  { %v277_v24 = vpop.xlane.xlu0 %276 }
 0x1ab   :  { %v280_v25 = vsub.f32 %v274_v21, %v277_v24  ;;  %v939_v21 = vld [vmem:[%s1471_s4] ss:$0 sm:$0xff] }
 0x1ad   :  { %v282_v26 = vmul.f32 1.442695, %v280_v25 }
 0x1af   :  { %1143 = vpow2.f32 %v282_v26 }
 0x1bc   :  { %v1144_v27 = vpop.eup %1143 }
 0x1bd   :  { %286 = vadd.xlane.f32.xlu0 %v1144_v27 }
 0x246   :  { %v287_v29 = vpop.xlane.xlu0 %286 }
 0x247   :  { %1145 = vrcp.f32 %v287_v29 }
 0x254   :  { %v1146_v30 = vpop.eup %1145 }
 0x255   :  { %v291_v31 = vmul.f32 %v1146_v30, %v1144_v27 }
 0x257   :  { %v310_v32 = vpack.c.bf16 %v1315_v28, %v291_v31 }
 0x259   :  { %347 = vxpose.xlu1.c.b16.start.end [1/1] (short) %v310_v32, 128  ;;  %1002 = vmatprep.subr.bf16.mxu1 %v310_v32 }
 0x25a   :  { %1003 = vmatpush3.bf16.msra.mxu1 %v310_v32  ;;  %v1140_v32 = vld [vmem:[#allocation10 + $0x10] sm:$0xff]  }
 0x25b   :  { %1020 = vmatprep.subr.bf16.mxu1 %v1315_v28 }
 0x2bb   :  { %v355_v33 = vpop.trf.xlu1 }
 0x2bc   :  { %1004 = vmatprep.mubr.msk.bf16.mxu1 %vm363_vm2, %v355_v33  ;;  %v1141_v33 = vld [vmem:[#allocation10 + $0x8] sm:$0xff]  }
 0x2bf   :  { %v356_v35 = vpop.trf.xlu1 }
 0x2c0   :  { %1005 = vmatmul.mubr.msk.bf16.vlgmr.msra.gmra.mxu1 %vm363_vm2, %v356_v35  ;;  %v948_v35 = vld [vmem:[%s1473_s6] ss:$0 sm:$0xff] }
 0x2c1   :  { %1021 = vmatpush3.bf16.msra.mxu1 %v1119_v34  ;;  %v1142_v34 = vld [vmem:[#allocation10] sm:$0xff]  }
 0x2c2   :  { %1022 = vmatprep.subr.bf16.mxu1 %v1315_v28 }
 0x2c3   :  { %v357_v37 = vpop.trf.xlu1 }
 0x2c4   :  { %1008 = vmatprep.mubr.msk.bf16.mxu1 %vm363_vm2, %v357_v37 }
 0x2c5   :  { %1023 = vmatpush3.bf16.msra.mxu1 %v1120_v36 }
 0x2c6   :  { %1024 = vmatprep.subr.bf16.mxu1 %v1315_v28 }
 0x2c7   :  { %v358_v39 = vpop.trf.xlu1 }
 0x2c8   :  { %1009 = vmatmul.mubr.msk.bf16.gmra.mxu1 %vm363_vm2, %v358_v39 }
 0x2c9   :  { %1025 = vmatpush3.bf16.msra.mxu1 %v1121_v38 }
 0x2ca   :  { %1026 = vmatprep.subr.bf16.mxu1 %v1315_v28 }
 0x2cb   :  { %v359_v41 = vpop.trf.xlu1 }
 0x2cc   :  { %1012 = vmatprep.mubr.msk.bf16.mxu1 %vm363_vm2, %v359_v41 }
 0x2cd   :  { %1027 = vmatpush3.bf16.msra.mxu1 %v1122_v40 }
 0x2ce   :  { %1028 = vmatprep.subr.bf16.mxu1 %v1315_v28 }
 0x2cf   :  { %v360_v43 = vpop.trf.xlu1 }
 0x2d0   :  { %1013 = vmatmul.mubr.msk.bf16.gmra.mxu1 %vm363_vm2, %v360_v43 }
 0x2d1   :  { %1029 = vmatpush3.bf16.msra.mxu1 %v1123_v42 }
 0x2d2   :  { %1030 = vmatprep.subr.bf16.mxu1 %v1315_v28 }
 0x2d3   :  { %v361_v46 = vpop.trf.xlu1 }
 0x2d4   :  { %1016 = vmatprep.mubr.msk.bf16.mxu1 %vm363_vm2, %v361_v46 }
 0x2d5   :  { %1031 = vmatpush3.bf16.msra.mxu1 %v1124_v44 }
 0x2d6   :  { %1032 = vmatprep.subr.bf16.mxu1 %v1315_v28 }
 0x2d7   :  { %v362_v50 = vpop.trf.xlu1 }
 0x2d8   :  { %1017 = vmatmul.mubr.msk.bf16.gmra.mxu1 %vm363_vm2, %v362_v50 }
 0x2d9   :  { %1033 = vmatpush3.bf16.msra.mxu1 %v1125_v48  ;;  %1036 = vmatprep.mubr.msk.bf16.mxu1 %vm1316_vm1, %v1315_v28 }
 0x2da   :  { %1034 = vmatprep.subr.bf16.mxu1 %v1315_v28 }
 0x2dd   :  { %1035 = vmatpush3.bf16.msra.mxu1 %v1126_v52 }
 0x2de   :  { %1060 = vmatprep.subr.bf16.mxu1 %v1315_v28 }
 0x2e0   :  { %1037 = vmatmul.mubr.bf16.vlgmr.msra.gmra.mxu1 %v519_v55 }
 0x2e1   :  { %1076 = vmatprep.mubr.msk.bf16.mxu1 %vm1316_vm1, %v1315_v28  ;;  %1061 = vmatpush3.bf16.msra.mxu1 %v1135_v0 }
 0x2e2   :  { %1062 = vmatprep.subr.bf16.mxu1 %v1315_v28 }
 0x2e5   :  { %1063 = vmatpush3.bf16.msra.mxu1 %v1136_v1 }
 0x2e6   :  { %1064 = vmatprep.subr.bf16.mxu1 %v1315_v28 }
 0x2e9   :  { %1065 = vmatpush3.bf16.msra.mxu1 %v1137_v2 }
 0x2ea   :  { %1066 = vmatprep.subr.bf16.mxu1 %v1315_v28 }
 0x2ed   :  { %1067 = vmatpush3.bf16.msra.mxu1 %v1138_v3 }
 0x2ee   :  { %1068 = vmatprep.subr.bf16.mxu1 %v1315_v28 }
 0x2f1   :  { %1069 = vmatpush3.bf16.msra.mxu1 %v1139_v4 }
 0x2f2   :  { %1070 = vmatprep.subr.bf16.mxu1 %v1315_v28 }
 0x2f5   :  { %1071 = vmatpush3.bf16.msra.mxu1 %v1140_v32 }
 0x2f6   :  { %1072 = vmatprep.subr.bf16.mxu1 %v1315_v28 }
 0x2f9   :  { %1073 = vmatpush3.bf16.msra.mxu1 %v1141_v33 }
 0x2fa   :  { %1074 = vmatprep.subr.bf16.mxu1 %v1315_v28 }
 0x2fd   :  { %1075 = vmatpush3.bf16.msra.mxu1 %v1142_v34 }
 0x380   :  { %v1006_v5 = vpop.f32.mrf.mxu1 }
 0x381   :  { %503 = vst [vmem:[#allocation12 + $0x10] sm:$0xff] %v1006_v5 }
 0x382   :  { %v422_v6 = vpop.f32.mrf.mxu1 }
 0x383   :  { %501 = vst [vmem:[#allocation12] sm:$0xff] %v422_v6 }
 0x384   :  { %v1007_v7 = vpop.f32.mrf.mxu1 }
 0x385   :  { %504 = vst [vmem:[#allocation12 + $0x18] sm:$0xff] %v1007_v7 }
 0x386   :  { %v425_v8 = vpop.f32.mrf.mxu1 }
 0x387   :  { %502 = vst [vmem:[#allocation12 + $0x8] sm:$0xff] %v425_v8 }
 0x388   :  { %v1010_v9 = vpop.f32.mrf.mxu1 }
 0x389   :  { %507 = vst [vmem:[#allocation12 + $0x30] sm:$0xff] %v1010_v9 }
 0x38a   :  { %v438_v10 = vpop.f32.mrf.mxu1 }
 0x38b   :  { %505 = vst [vmem:[#allocation12 + $0x20] sm:$0xff] %v438_v10 }
 0x38c   :  { %v1011_v11 = vpop.f32.mrf.mxu1 }
 0x38d   :  { %508 = vst [vmem:[#allocation12 + $0x38] sm:$0xff] %v1011_v11 }
 0x38e   :  { %v441_v12 = vpop.f32.mrf.mxu1 }
 0x38f   :  { %506 = vst [vmem:[#allocation12 + $0x28] sm:$0xff] %v441_v12 }
 0x390   :  { %v1014_v13 = vpop.f32.mrf.mxu1 }
 0x391   :  { %511 = vst [vmem:[#allocation12 + $0x50] sm:$0xff] %v1014_v13 }
 0x392   :  { %v454_v14 = vpop.f32.mrf.mxu1 }
 0x393   :  { %509 = vst [vmem:[#allocation12 + $0x40] sm:$0xff] %v454_v14 }
 0x394   :  { %v1015_v15 = vpop.f32.mrf.mxu1 }
 0x395   :  { %512 = vst [vmem:[#allocation12 + $0x58] sm:$0xff] %v1015_v15 }
 0x396   :  { %v457_v16 = vpop.f32.mrf.mxu1 }
 0x397   :  { %510 = vst [vmem:[#allocation12 + $0x48] sm:$0xff] %v457_v16 }
 0x398   :  { %v1018_v17 = vpop.f32.mrf.mxu1 }
 0x399   :  { %515 = vst [vmem:[#allocation12 + $0x70] sm:$0xff] %v1018_v17 }
 0x39a   :  { %v470_v18 = vpop.f32.mrf.mxu1 }
 0x39b   :  { %513 = vst [vmem:[#allocation12 + $0x60] sm:$0xff] %v470_v18 }
 0x39c   :  { %v1019_v19 = vpop.f32.mrf.mxu1 }
 0x39d   :  { %516 = vst [vmem:[#allocation12 + $0x78] sm:$0xff] %v1019_v19 }
 0x39e   :  { %v473_v20 = vpop.f32.mrf.mxu1 }
 0x39f   :  { %514 = vst [vmem:[#allocation12 + $0x68] sm:$0xff] %v473_v20 }
 0x3a0   :  { %v625_v22 = vpop.f32.mrf.mxu1 }
 0x3a1   :  { %v626_v24 = vadd.f32 %v939_v21, %v625_v22 }
 0x3a2   :  { %v1038_v23 = vpop.f32.mrf.mxu1 }
 0x3a3   :  { %v632_v29 = vmax.f32 %v626_v24, 0.0 }
 0x3a4   :  { %v628_v25 = vpop.f32.mrf.mxu1 }
 0x3a5   :  { %v629_v26 = vadd.f32 %v939_v21, %v628_v25 }
 0x3a6   :  { %v1039_v27 = vpop.f32.mrf.mxu1 }
 0x3a7   :  { %v633_v30 = vmax.f32 %v629_v26, 0.0 }
 0x3a9   :  { %v634_v31 = vpack.c.bf16 %v633_v30, %v632_v29 }
 0x3ab   :  { %1057 = vmatmul.mubr.bf16.vlgmr.msra.gmra.mxu0 %v634_v31 }
 0x46b   :  { %v740_v36 = vpop.f32.mrf.mxu0 }
 0x46c   :  { %v741_v38 = vadd.f32 %v948_v35, %v740_v36 }
 0x46d   :  { %v1058_v37 = vpop.f32.mrf.mxu0 }
 0x46e   :  { %v747_v42 = vmax.f32 %v741_v38, 0.0 }
 0x46f   :  { %v743_v39 = vpop.f32.mrf.mxu0 }
 0x470   :  { %v744_v40 = vadd.f32 %v948_v35, %v743_v39 }
 0x471   :  { %v1059_v41 = vpop.f32.mrf.mxu0 }
 0x472   :  { %v748_v43 = vmax.f32 %v744_v40, 0.0 }
 0x474   :  { %v749_v44 = vpack.c.bf16 %v748_v43, %v747_v42 }
 0x476   :  { %1077 = vmatmul.mubr.bf16.vlgmr.msra.gmra.mxu1 %v749_v44 }
 0x477   :  { %1266 = shalt.err (!%p1263_p1)
}
 0x478   :  { %901 = dma.vmem_to_hbm [thread:$0]  %s896_s24, 2048, %s1477_s10, [#allocation13], %s1306_s16, %s1306_s16, %s1307_s17  }
 0x479   :  { %v957_v28 = vld [vmem:[%s1475_s8] ss:$0 sm:$0xff]  ;;  %s1318_s8 = smov [#allocation11]  }
 0x47a   :  { %s883_s10 = sshll.u32 %s1318_s8, 4  ;;  %s884_s10 = int_to_ptr.vmem [resolvable:$true] %s883_s10 }
 0x47b   :  { %s1275_s1 = scalar_lea.vmem %s884_s10, 256  ;;  %p1280_p3 = scmp.lt.s32.totalorder %s884_s10, %s884_s10 }
 0x47c   :  { %p1276_p2 = scmp.ne.s32.totalorder %s884_s10, %s1275_s1  ;;  %p1281_p4 = scmp.lt.s32.totalorder %s1275_s1, %s1275_s1 }
 0x47e   :  { %p1282_p5 = por %p1281_p4, %p1280_p3 }
 0x480   :  { %p1283_p6 = pnand %p1282_p5, %p1276_p2 }
 0x536   :  { %v855_v45 = vpop.f32.mrf.mxu1 }
 0x537   :  { %v856_v46 = vadd.f32 %v957_v28, %v855_v45 }
 0x538   :  { %v1078_v47 = vpop.f32.mrf.mxu1 }
 0x539   :  { %v862_v48 = vsub.f32 0.0, %v856_v46 }
 0x53a   :  { %v858_v49 = vpop.f32.mrf.mxu1 }
 0x53b   :  { %v864_v50 = vmul.f32 1.442695, %v862_v48  ;;  %v859_v51 = vadd.f32 %v957_v28, %v858_v49 }
 0x53c   :  { %v1079_v52 = vpop.f32.mrf.mxu1 }
 0x53d   :  { %1147 = vpow2.f32 %v864_v50  ;;  %v863_v53 = vsub.f32 0.0, %v859_v51 }
 0x53f   :  { %v866_v54 = vmul.f32 1.442695, %v863_v53 }
 0x541   :  { %1149 = vpow2.f32 %v866_v54 }
 0x54a   :  { %v1148_v55 = vpop.eup %1147 }
 0x54b   :  { %v868_v56 = vadd.f32 1.0, %v1148_v55 }
 0x54d   :  { %1151 = vrcp.f32 %v868_v56 }
 0x54e   :  { %v1150_v57 = vpop.eup %1149 }
 0x54f   :  { %v869_v58 = vadd.f32 1.0, %v1150_v57 }
 0x551   :  { %1153 = vrcp.f32 %v869_v58 }
 0x55a   :  { %v1152_v59 = vpop.eup %1151 }
 0x55b   :  { %872 = vst [vmem:[#allocation11] sm:$0xff] %v1152_v59 }
 0x55e   :  { %v1154_v60 = vpop.eup %1153 }
 0x55f   :  { %873 = vst [vmem:[#allocation11 + $0x8] sm:$0xff] %v1154_v60 }
 0x560   :  { %1286 = shalt.err (!%p1283_p6)
}
 0x561   :  { %889 = dma.vmem_to_hbm [thread:$0]  %s884_s10, 256, %s1476_s9, [#allocation4], %s1306_s16, %s1306_s16, %s1307_s17  }
 0x562   :  { %1301 = dma.done.wait [#allocation4], 256  }
 0x563   :  { %1302 = vsyncadd [#allocation4], 4294967040 }
 0x564   :  { %1303 = dma.done.wait [#allocation13], 2048  }
 0x565   :  { %1304 = vsyncadd [#allocation13], 4294965248 }
 0x566   :  { %908 = vsyncpa [#allocation3], 1 }
 0x567   :  { %909 = vsyncpa [#allocation6], 1 }
 0x568   :  { %910 = vsyncpa [#allocation9], 1 }
 0x569   :  { %911 = vsyncpa [#allocation4], 1 }
 0x56a   :  { %912 = vsyncpa [#allocation13], 1 }

</bundles_post_ra>
